<compile_context>
chip_gen: v5e
topology: v5e:2x2
jax: 0.10.0
libtpu: 0.0.40
codegen_flags: <defaults>
</compile_context>

<pallas_src>
import math

import jax
import jax.numpy as jnp
from jax.experimental import pallas as pl
from jax.experimental.pallas import tpu as pltpu

STATE_DIM = 4
HID = 16
ACTION_DIM = 1
STD_MIN = 0.001
STD_MAX = 1.0
LOG_STD_MIN = math.log(STD_MIN)
LOG_STD_MAX = math.log(STD_MAX)
LOG_SQRT_2PI = 0.5 * math.log(2.0 * math.pi)

_BN_MAX = 16 * 1024                 # max batch rows per grid step
_ALIGN = 2048                       # batch-tile alignment (keeps jn % 128 == 0)
_VMEM_LIMIT = 48 * 1024 * 1024      # fits v7x's 64 MiB physical VMEM with headroom
_PACK_ROWS = ((2 * HID + 2 * ACTION_DIM + 7) // 8) * 8   # packed-parameter slab rows
_PACK_COLS = 128                    # one lane tile; biases live in column HID


def _controller_kernel(state_ref, eps_ref, params_ref, out_ref):
    S, H, A = STATE_DIM, HID, ACTION_DIM
    jn = out_ref.shape[2]           # lane width of the dense tail
    bn = 8 * jn                     # batch rows handled by this grid step

    # --- packed parameter slab: one DMA, VMEM-resident across all grid steps ---
    w1 = params_ref[0:H, 0:S]                        # [H, S]
    b1 = params_ref[0:H, H:H + 1]                    # [H, 1]
    w2 = params_ref[H:2 * H, 0:H]                    # [H, H]
    b2 = params_ref[H:2 * H, H:H + 1]                # [H, 1]
    wh = params_ref[2 * H:2 * H + 2 * A, 0:H]        # [2A, H]  (mean rows, then log_std rows)
    bh = params_ref[2 * H:2 * H + 2 * A, H:H + 1]    # [2A, 1]

    # --- layer 1: contract on the feature axis of the natural [bn, S] block ---
    # "NT" dot_general (same dimension numbers as q @ k^T in flash attention), so
    # batch lands on the 128-lane axis with no wrapper- or kernel-side transpose.
    # Done in sub-chunks so the lane-padded [ck, S] operand value never gets large.
    dn_nt = (((1,), (1,)), ((), ()))
    ck = 4096 if bn % 4096 == 0 else (2048 if bn % 2048 == 0 else bn)
    parts = []
    for q in range(bn // ck):
        xq = state_ref[q * ck:(q + 1) * ck, :]       # [ck, S]
        parts.append(jax.lax.dot_general(
            w1, xq, dn_nt, preferred_element_type=jnp.float32))
    h1 = parts[0] if len(parts) == 1 else jnp.concatenate(parts, axis=1)
    h1 = jnp.maximum(h1 + b1, 0.0)                   # [H, bn], sublane-dense

    h2 = jnp.maximum(
        jnp.dot(w2, h1, preferred_element_type=jnp.float32) + b2, 0.0)       # [H, bn]
    heads = jnp.dot(wh, h2, preferred_element_type=jnp.float32) + bh         # [2A, bn]

    # --- sublane-dense transcendental tail ---
    for ai in range(A):
        mean_row = heads[ai:ai + 1, :]               # [1, bn]
        ls_row = heads[A + ai:A + ai + 1, :]         # [1, bn]
        # Fold the bn lanes into full (8, jn) vregs: the exp/tanh/log chain then runs
        # at 8/8 sublane utilisation instead of 1/8 (the binding slot on v7x otherwise).
        mean8 = jnp.concatenate(
            [mean_row[:, r * jn:(r + 1) * jn] for r in range(8)], axis=0)    # [8, jn]
        ls8 = jnp.concatenate(
            [ls_row[:, r * jn:(r + 1) * jn] for r in range(8)], axis=0)      # [8, jn]

        # clamp(exp(ls), MIN, MAX) == exp(clip(ls, log MIN, log MAX)); log(std) == ls8.
        ls8 = jnp.clip(ls8, LOG_STD_MIN, LOG_STD_MAX)
        std8 = jnp.exp(ls8)
        eps8 = eps_ref[ai]                           # [8, jn], already dense (free reshape)
        z8 = mean8 + std8 * eps8                     # reparameterised sample
        a8 = jnp.tanh(z8)
        # Normal(mean, std).log_prob(z): (z - mean)/std == eps by construction,
        # so no subtraction / reciprocal needed; then the tanh correction.
        lp8 = (-0.5 * (eps8 * eps8) - ls8 - LOG_SQRT_2PI
               - jnp.log(1.0 - a8 * a8 + 1e-6))

        out_ref[ai] = a8                             # dense (8, jn) stores
        out_ref[A + ai] = lp8


def _round_up(x, m):
    return ((x + m - 1) // m) * m


def _plan_tiles(B):
    """(padded batch, rows per grid step, #grid steps).  Batch is padded to a tile
    multiple (review: safer than a single full-array fallback on v7x); any B > _BN_MAX
    yields nb >= 2 so both v7x TensorCores get work."""
    b_pad = _round_up(max(B, 1), _ALIGN)
    nb = pl.cdiv(b_pad, _BN_MAX)
    bn = _round_up(pl.cdiv(b_pad, nb), _ALIGN)
    return bn * nb, bn, nb


def pack_params(params):
    """Pack the 6 weight/bias arrays into one (8,128)-aligned f32 slab (one DMA)."""
    w1, b1, w2, b2, wm, bm, ws, bs = params
    H, S, A = HID, STATE_DIM, ACTION_DIM
    p = jnp.zeros((_PACK_ROWS, _PACK_COLS), jnp.float32)
    p = p.at[0:H, 0:S].set(w1)
    p = p.at[0:H, H].set(b1[:, 0])
    p = p.at[H:2 * H, 0:H].set(w2)
    p = p.at[H:2 * H, H].set(b2[:, 0])
    p = p.at[2 * H:2 * H + A, 0:H].set(wm)
    p = p.at[2 * H:2 * H + A, H].set(bm[:, 0])
    p = p.at[2 * H + A:2 * H + 2 * A, 0:H].set(ws)
    p = p.at[2 * H + A:2 * H + 2 * A, H].set(bs[:, 0])
    return p


def controller_forward(state, eps, params):
    """state: [B, STATE_DIM] f32 (module's native layout), eps: [ACTION_DIM, B]
    standard-normal noise (batch-last, so no transpose is needed anywhere).
    Returns (a, log_pi), each [B, ACTION_DIM] - same semantics as controller.forward."""
    B = state.shape[0]
    A = ACTION_DIM
    p_slab = pack_params(params)

    b_pad, bn, nb = _plan_tiles(B)
    jn = bn // 8

    if b_pad != B:
        state = jnp.pad(state, ((0, b_pad - B), (0, 0)))
        eps = jnp.pad(eps, ((0, 0), (0, b_pad - B)))
    # Free (contiguous, batch-fastest) reshape: no HBM transpose anywhere.
    eps3 = eps.reshape(A, 8 * nb, jn)

    in_specs = [
        pl.BlockSpec((bn, STATE_DIM), lambda i: (i, 0)),            # state tile, natural layout
        pl.BlockSpec((A, 8, jn), lambda i: (0, i, 0)),              # dense noise tile
        pl.BlockSpec((_PACK_ROWS, _PACK_COLS), lambda i: (0, 0)),   # resident packed params
    ]
    out_specs = pl.BlockSpec((2 * A, 8, jn), lambda i: (0, i, 0))

    stacked = pl.pallas_call(
        _controller_kernel,
        out_shape=jax.ShapeDtypeStruct((2 * A, 8 * nb, jn), jnp.float32),
        grid=(nb,),
        in_specs=in_specs,
        out_specs=out_specs,
        compiler_params=pltpu.CompilerParams(
            dimension_semantics=("parallel",),   # v7x: the two TCs split the batch when nb >= 2
            vmem_limit_bytes=_VMEM_LIMIT,
        ),
    )(state, eps3, p_slab)

    # Output rows are already batch-contiguous: recovering [B, A] is a free reshape
    # (plus a degenerate transpose for A == 1).
    a = stacked[:A].reshape(A, b_pad)[:, :B].T
    log_pi = stacked[A:].reshape(A, b_pad)[:, :B].T
    return a, log_pi


def init_params(key):
    """Deterministic init mimicking the PyTorch module.
    nn.Linear default: U(-1/sqrt(fan_in), 1/sqrt(fan_in)); heads: U(-0.001, 0.001).
    Weights stored as [out_features, in_features], biases as [out_features, 1]."""
    ks = jax.random.split(key, 8)

    def uni(k, shape, bound):
        return jax.random.uniform(k, shape, jnp.float32, -bound, bound)

    bnd1 = 1.0 / math.sqrt(STATE_DIM)
    bnd2 = 1.0 / math.sqrt(HID)
    init_w = 0.001
    w1 = uni(ks[0], (HID, STATE_DIM), bnd1)
    b1 = uni(ks[1], (HID, 1), bnd1)
    w2 = uni(ks[2], (HID, HID), bnd2)
    b2 = uni(ks[3], (HID, 1), bnd2)
    wm = uni(ks[4], (ACTION_DIM, HID), init_w)
    bm = uni(ks[5], (ACTION_DIM, 1), init_w)
    ws = uni(ks[6], (ACTION_DIM, HID), init_w)
    bs = uni(ks[7], (ACTION_DIM, 1), init_w)
    return (w1, b1, w2, b2, wm, bm, ws, bs)


if __name__ == "__main__":
    key = jax.random.PRNGKey(0)
    k_param, k_state, k_eps = jax.random.split(key, 3)

    B = 8
    params = init_params(k_param)
    state = jax.random.normal(k_state, (B, STATE_DIM), jnp.float32)
    # rsample noise drawn in plain JAX, batch-last (consumed inside the kernel).
    eps = jax.random.normal(k_eps, (ACTION_DIM, B), jnp.float32)

    a, log_pi = jax.jit(controller_forward)(state, eps, params)
    jax.block_until_ready((a, log_pi))

    # Reference in plain JAX using the *original* op order (clip std after exp,
    # explicit (z - mean)/std) to verify the kernel's algebraic shortcuts.
    w1, b1, w2, b2, wm, bm, ws, bs = params
    h = jnp.maximum(state @ w1.T + b1.T, 0.0)
    h = jnp.maximum(h @ w2.T + b2.T, 0.0)
    mean = h @ wm.T + bm.T
    log_std = h @ ws.T + bs.T
    std = jnp.clip(jnp.exp(log_std), STD_MIN, STD_MAX)
    z = mean + std * eps.T
    a_ref = jnp.tanh(z)
    lp_ref = (-0.5 * ((z - mean) / std) ** 2 - jnp.log(std) - LOG_SQRT_2PI
              - jnp.log(1.0 - a_ref ** 2 + 1e-6))

    assert a.shape == (B, ACTION_DIM) and log_pi.shape == (B, ACTION_DIM)
    assert jnp.allclose(a, a_ref, atol=3e-5), "action mismatch"
    assert jnp.allclose(log_pi, lp_ref, atol=3e-4), "log_pi mismatch"

    print("KERNEL_OK")
</pallas_src>

<mosaic_0001>
module attributes {stable_mosaic.version = 11 : i64} {
  func.func @_controller_kernel(%arg0: i32, %arg1: memref<2048x4xf32, #tpu.memory_space<vmem>>, %arg2: memref<1x8x256xf32, #tpu.memory_space<vmem>>, %arg3: memref<40x128xf32, #tpu.memory_space<vmem>>, %arg4: memref<2x8x256xf32, #tpu.memory_space<vmem>>) attributes {dimension_semantics = [#tpu.dimension_semantics<parallel>], iteration_bounds = array<i64: 1>, scalar_prefetch = 0 : i64, scratch_operands = 0 : i64, tpu.core_type = #tpu.core_type<tc>, window_params = [{transform_indices = @transform_0, window_bounds = array<i64: 2048, 4>}, {transform_indices = @transform_1, window_bounds = array<i64: 1, 8, 256>}, {pipeline_mode = #tpu.pipeline_mode<synchronous>, transform_indices = @transform_2, window_bounds = array<i64: 40, 128>}, {transform_indices = @transform_3, window_bounds = array<i64: 2, 8, 256>}]} {
    %c0 = arith.constant 0 : index
    %c0_0 = arith.constant 0 : index
    %0 = vector.load %arg3[%c0, %c0_0] : memref<40x128xf32, #tpu.memory_space<vmem>>, vector<16x4xf32>
    %c0_1 = arith.constant 0 : index
    %c16 = arith.constant 16 : index
    %1 = vector.load %arg3[%c0_1, %c16] : memref<40x128xf32, #tpu.memory_space<vmem>>, vector<16x1xf32>
    %c16_2 = arith.constant 16 : index
    %c0_3 = arith.constant 0 : index
    %2 = vector.load %arg3[%c16_2, %c0_3] : memref<40x128xf32, #tpu.memory_space<vmem>>, vector<16x16xf32>
    %c16_4 = arith.constant 16 : index
    %c16_5 = arith.constant 16 : index
    %3 = vector.load %arg3[%c16_4, %c16_5] : memref<40x128xf32, #tpu.memory_space<vmem>>, vector<16x1xf32>
    %c32 = arith.constant 32 : index
    %c0_6 = arith.constant 0 : index
    %4 = vector.load %arg3[%c32, %c0_6] : memref<40x128xf32, #tpu.memory_space<vmem>>, vector<2x16xf32>
    %c32_7 = arith.constant 32 : index
    %c16_8 = arith.constant 16 : index
    %5 = vector.load %arg3[%c32_7, %c16_8] : memref<40x128xf32, #tpu.memory_space<vmem>>, vector<2x1xf32>
    %c0_9 = arith.constant 0 : index
    %c0_10 = arith.constant 0 : index
    %6 = vector.load %arg1[%c0_9, %c0_10] : memref<2048x4xf32, #tpu.memory_space<vmem>>, vector<2048x4xf32>
    %cst = arith.constant dense<0.000000e+00> : vector<16x2048xf32>
    %7 = tpu.matmul %0, %6, %cst {dimension_numbers = #tpu.dot_dimension_numbers<[1], [1], [0], [0], [0, 0, 1, 0], [], []>} : vector<16x4xf32>, vector<2048x4xf32>, vector<16x2048xf32> -> vector<16x2048xf32>
    %8 = vector.broadcast %1 : vector<16x1xf32> to vector<16x2048xf32>
    %9 = arith.addf %7, %8 : vector<16x2048xf32>
    %cst_11 = arith.constant 0.000000e+00 : f32
    %10 = vector.broadcast %cst_11 : f32 to vector<16x2048xf32>
    %11 = arith.maximumf %9, %10 : vector<16x2048xf32>
    %cst_12 = arith.constant dense<0.000000e+00> : vector<16x2048xf32>
    %12 = tpu.matmul %2, %11, %cst_12 {dimension_numbers = #tpu.dot_dimension_numbers<[1], [0], [0], [1], [0, 0, 1, 1], [], []>} : vector<16x16xf32>, vector<16x2048xf32>, vector<16x2048xf32> -> vector<16x2048xf32>
    %13 = vector.broadcast %3 : vector<16x1xf32> to vector<16x2048xf32>
    %14 = arith.addf %12, %13 : vector<16x2048xf32>
    %cst_13 = arith.constant 0.000000e+00 : f32
    %15 = vector.broadcast %cst_13 : f32 to vector<16x2048xf32>
    %16 = arith.maximumf %14, %15 : vector<16x2048xf32>
    %cst_14 = arith.constant dense<0.000000e+00> : vector<2x2048xf32>
    %17 = tpu.matmul %4, %16, %cst_14 {dimension_numbers = #tpu.dot_dimension_numbers<[1], [0], [0], [1], [0, 0, 1, 1], [], []>} : vector<2x16xf32>, vector<16x2048xf32>, vector<2x2048xf32> -> vector<2x2048xf32>
    %18 = vector.broadcast %5 : vector<2x1xf32> to vector<2x2048xf32>
    %19 = arith.addf %17, %18 : vector<2x2048xf32>
    %20 = vector.extract_strided_slice %19 {offsets = [0, 0], sizes = [1, 2048], strides = [1, 1]} : vector<2x2048xf32> to vector<1x2048xf32>
    %21 = vector.extract_strided_slice %19 {offsets = [1, 0], sizes = [1, 2048], strides = [1, 1]} : vector<2x2048xf32> to vector<1x2048xf32>
    %22 = vector.extract_strided_slice %20 {offsets = [0, 0], sizes = [1, 256], strides = [1, 1]} : vector<1x2048xf32> to vector<1x256xf32>
    %23 = vector.extract_strided_slice %20 {offsets = [0, 256], sizes = [1, 256], strides = [1, 1]} : vector<1x2048xf32> to vector<1x256xf32>
    %24 = vector.extract_strided_slice %20 {offsets = [0, 512], sizes = [1, 256], strides = [1, 1]} : vector<1x2048xf32> to vector<1x256xf32>
    %25 = vector.extract_strided_slice %20 {offsets = [0, 768], sizes = [1, 256], strides = [1, 1]} : vector<1x2048xf32> to vector<1x256xf32>
    %26 = vector.extract_strided_slice %20 {offsets = [0, 1024], sizes = [1, 256], strides = [1, 1]} : vector<1x2048xf32> to vector<1x256xf32>
    %27 = vector.extract_strided_slice %20 {offsets = [0, 1280], sizes = [1, 256], strides = [1, 1]} : vector<1x2048xf32> to vector<1x256xf32>
    %28 = vector.extract_strided_slice %20 {offsets = [0, 1536], sizes = [1, 256], strides = [1, 1]} : vector<1x2048xf32> to vector<1x256xf32>
    %29 = vector.extract_strided_slice %20 {offsets = [0, 1792], sizes = [1, 256], strides = [1, 1]} : vector<1x2048xf32> to vector<1x256xf32>
    %30 = tpu.concatenate %22, %23, %24, %25, %26, %27, %28, %29 in 0 : vector<1x256xf32>, vector<1x256xf32>, vector<1x256xf32>, vector<1x256xf32>, vector<1x256xf32>, vector<1x256xf32>, vector<1x256xf32>, vector<1x256xf32> -> vector<8x256xf32>
    %31 = vector.extract_strided_slice %21 {offsets = [0, 0], sizes = [1, 256], strides = [1, 1]} : vector<1x2048xf32> to vector<1x256xf32>
    %32 = vector.extract_strided_slice %21 {offsets = [0, 256], sizes = [1, 256], strides = [1, 1]} : vector<1x2048xf32> to vector<1x256xf32>
    %33 = vector.extract_strided_slice %21 {offsets = [0, 512], sizes = [1, 256], strides = [1, 1]} : vector<1x2048xf32> to vector<1x256xf32>
    %34 = vector.extract_strided_slice %21 {offsets = [0, 768], sizes = [1, 256], strides = [1, 1]} : vector<1x2048xf32> to vector<1x256xf32>
    %35 = vector.extract_strided_slice %21 {offsets = [0, 1024], sizes = [1, 256], strides = [1, 1]} : vector<1x2048xf32> to vector<1x256xf32>
    %36 = vector.extract_strided_slice %21 {offsets = [0, 1280], sizes = [1, 256], strides = [1, 1]} : vector<1x2048xf32> to vector<1x256xf32>
    %37 = vector.extract_strided_slice %21 {offsets = [0, 1536], sizes = [1, 256], strides = [1, 1]} : vector<1x2048xf32> to vector<1x256xf32>
    %38 = vector.extract_strided_slice %21 {offsets = [0, 1792], sizes = [1, 256], strides = [1, 1]} : vector<1x2048xf32> to vector<1x256xf32>
    %39 = tpu.concatenate %31, %32, %33, %34, %35, %36, %37, %38 in 0 : vector<1x256xf32>, vector<1x256xf32>, vector<1x256xf32>, vector<1x256xf32>, vector<1x256xf32>, vector<1x256xf32>, vector<1x256xf32>, vector<1x256xf32> -> vector<8x256xf32>
    %cst_15 = arith.constant -6.90775537 : f32
    %cst_16 = arith.constant 0.000000e+00 : f32
    %40 = vector.broadcast %cst_15 : f32 to vector<8x256xf32>
    %41 = arith.maximumf %40, %39 : vector<8x256xf32>
    %42 = vector.broadcast %cst_16 : f32 to vector<8x256xf32>
    %43 = arith.minimumf %42, %41 : vector<8x256xf32>
    %44 = math.exp %43 : vector<8x256xf32>
    %c0_17 = arith.constant 0 : index
    %c0_18 = arith.constant 0 : index
    %c0_19 = arith.constant 0 : index
    %45 = vector.load %arg2[%c0_17, %c0_18, %c0_19] : memref<1x8x256xf32, #tpu.memory_space<vmem>>, vector<1x8x256xf32>
    %46 = vector.shape_cast %45 : vector<1x8x256xf32> to vector<8x256xf32>
    %47 = arith.mulf %44, %46 : vector<8x256xf32>
    %48 = arith.addf %30, %47 : vector<8x256xf32>
    %49 = math.tanh %48 : vector<8x256xf32>
    %50 = arith.mulf %46, %46 : vector<8x256xf32>
    %cst_20 = arith.constant -5.000000e-01 : f32
    %51 = vector.broadcast %cst_20 : f32 to vector<8x256xf32>
    %52 = arith.mulf %51, %50 : vector<8x256xf32>
    %53 = arith.subf %52, %43 : vector<8x256xf32>
    %cst_21 = arith.constant 0.918938517 : f32
    %54 = vector.broadcast %cst_21 : f32 to vector<8x256xf32>
    %55 = arith.subf %53, %54 : vector<8x256xf32>
    %56 = arith.mulf %49, %49 : vector<8x256xf32>
    %cst_22 = arith.constant 1.000000e+00 : f32
    %57 = vector.broadcast %cst_22 : f32 to vector<8x256xf32>
    %58 = arith.subf %57, %56 : vector<8x256xf32>
    %cst_23 = arith.constant 9.99999997E-7 : f32
    %59 = vector.broadcast %cst_23 : f32 to vector<8x256xf32>
    %60 = arith.addf %58, %59 : vector<8x256xf32>
    %61 = math.log %60 : vector<8x256xf32>
    %62 = arith.subf %55, %61 : vector<8x256xf32>
    %c0_24 = arith.constant 0 : index
    %c0_25 = arith.constant 0 : index
    %c0_26 = arith.constant 0 : index
    %63 = vector.load %arg4[%c0_24, %c0_25, %c0_26] : memref<2x8x256xf32, #tpu.memory_space<vmem>>, vector<1x8x256xf32>
    %64 = vector.shape_cast %63 : vector<1x8x256xf32> to vector<8x256xf32>
    %65 = vector.shape_cast %49 : vector<8x256xf32> to vector<1x8x256xf32>
    tpu.vector_store %arg4[%c0_24, %c0_25, %c0_26], %65 {strides = array<i32>} : memref<2x8x256xf32, #tpu.memory_space<vmem>>, vector<1x8x256xf32>,
    %c1 = arith.constant 1 : index
    %c0_27 = arith.constant 0 : index
    %c0_28 = arith.constant 0 : index
    %66 = vector.load %arg4[%c1, %c0_27, %c0_28] : memref<2x8x256xf32, #tpu.memory_space<vmem>>, vector<1x8x256xf32>
    %67 = vector.shape_cast %66 : vector<1x8x256xf32> to vector<8x256xf32>
    %68 = vector.shape_cast %62 : vector<8x256xf32> to vector<1x8x256xf32>
    tpu.vector_store %arg4[%c1, %c0_27, %c0_28], %68 {strides = array<i32>} : memref<2x8x256xf32, #tpu.memory_space<vmem>>, vector<1x8x256xf32>,
    return
  }
  func.func @transform_0(%arg0: i32) -> (i32, i32) {
    %c0_i32 = arith.constant 0 : i32
    %c0_i32_0 = arith.constant 0 : i32
    return %arg0, %c0_i32 : i32, i32
  }
  func.func @transform_1(%arg0: i32) -> (i32, i32, i32) {
    %c0_i32 = arith.constant 0 : i32
    %c0_i32_0 = arith.constant 0 : i32
    %c0_i32_1 = arith.constant 0 : i32
    return %c0_i32, %arg0, %c0_i32_0 : i32, i32, i32
  }
  func.func @transform_2(%arg0: i32) -> (i32, i32) {
    %c0_i32 = arith.constant 0 : i32
    %c0_i32_0 = arith.constant 0 : i32
    %c0_i32_1 = arith.constant 0 : i32
    return %c0_i32, %c0_i32_0 : i32, i32
  }
  func.func @transform_3(%arg0: i32) -> (i32, i32, i32) {
    %c0_i32 = arith.constant 0 : i32
    %c0_i32_0 = arith.constant 0 : i32
    %c0_i32_1 = arith.constant 0 : i32
    return %c0_i32, %arg0, %c0_i32_0 : i32, i32, i32
  }
}

</mosaic_0001>

<bundles_post_ra>
// kernel: controller_forward.1
= control target key start
LH: loop header
LB: loop body
LE: loop exit
PB: predicated region body
PF: predicated region fallthrough
CT: control target
= control target key end

     0   :  { %vm285_vm0 = vcmask 31744   ;;  %vm1468_vm1 = vcmask 130048   ;;  %vm2242_vm2 = vcmask 1040384   ;;  %vm2245_vm3 = vcmask 1041408   ;;  %s4105_s0 = inlined_call_operand.vmem [shape: f32[2048,4], index: 0, kind: input, shape index: {}]   ;;  %s4106_s2 = inlined_call_operand.vmem [shape: f32[40,128], index: 2, kind: input, shape index: {}]   ;;  %s4107_s1 = inlined_call_operand.vmem [shape: f32[1,8,256], index: 1, kind: input, shape index: {}]   ;;  %s4108_s3 = inlined_call_operand.vmem [shape: f32[2,8,256], index: 3, kind: output, shape index: {}]  }
   0x1   :  { %v34_v0 = vld [vmem:[%s4105_s0 + $0x78] sm:$0xff]  ;;  %v33_v4 = vld [vmem:[%s4105_s0 + $0x70] sm:$0xff]  ;;  %v32_v8 = vld [vmem:[%s4105_s0 + $0x68] sm:$0xff]  ;;  %vm2248_vm4 = vcmask 1042432   ;;  %vm2251_vm5 = vcmask 1043456   ;;  %vm2254_vm6 = vcmask 1044480  }
   0x2   :  { %v50_v1 = vld [vmem:[%s4105_s0 + $0xf8] sm:$0xff]  ;;  %2352 = vmatpush.xpose.msk.msra.mxu0 %vm285_vm0, %v34_v0  ;;  %v49_v5 = vld [vmem:[%s4105_s0 + $0xf0] sm:$0xff]  ;;  %v48_v9 = vld [vmem:[%s4105_s0 + $0xe8] sm:$0xff]  ;;  %vm2257_vm7 = vcmask 1045504   ;;  %vm2260_vm8 = vcmask 1046528  }
   0x3   :  { %v66_v2 = vld [vmem:[%s4105_s0 + $0x178] sm:$0xff]  ;;  %2370 = vmatpush.xpose.msk.msra.mxu1 %vm285_vm0, %v50_v1  ;;  %v65_v6 = vld [vmem:[%s4105_s0 + $0x170] sm:$0xff]  ;;  %v64_v10 = vld [vmem:[%s4105_s0 + $0x168] sm:$0xff] }
   0x4   :  { %v82_v3 = vld [vmem:[%s4105_s0 + $0x1f8] sm:$0xff]  ;;  %2388 = vmatpush.xpose.msk.msra.mxu2 %vm285_vm0, %v66_v2  ;;  %v81_v7 = vld [vmem:[%s4105_s0 + $0x1f0] sm:$0xff]  ;;  %v80_v11 = vld [vmem:[%s4105_s0 + $0x1e8] sm:$0xff] }
   0x5   :  { %2406 = vmatpush.xpose.msk.msra.mxu3 %vm285_vm0, %v82_v3  ;;  %v31_v12 = vld [vmem:[%s4105_s0 + $0x60] sm:$0xff]  ;;  %v30_v16 = vld [vmem:[%s4105_s0 + $0x58] sm:$0xff]  ;;  %v29_v20 = vld [vmem:[%s4105_s0 + $0x50] sm:$0xff] }
   0x6   :  { %2353 = vmatpush.xpose.msk.msra.mxu0 %vm285_vm0, %v33_v4  ;;  %v47_v13 = vld [vmem:[%s4105_s0 + $0xe0] sm:$0xff]  ;;  %v46_v17 = vld [vmem:[%s4105_s0 + $0xd8] sm:$0xff]  ;;  %v45_v21 = vld [vmem:[%s4105_s0 + $0xd0] sm:$0xff] }
   0x7   :  { %2371 = vmatpush.xpose.msk.msra.mxu1 %vm285_vm0, %v49_v5  ;;  %v63_v14 = vld [vmem:[%s4105_s0 + $0x160] sm:$0xff]  ;;  %v62_v18 = vld [vmem:[%s4105_s0 + $0x158] sm:$0xff]  ;;  %v61_v22 = vld [vmem:[%s4105_s0 + $0x150] sm:$0xff] }
   0x8   :  { %2389 = vmatpush.xpose.msk.msra.mxu2 %vm285_vm0, %v65_v6  ;;  %v79_v15 = vld [vmem:[%s4105_s0 + $0x1e0] sm:$0xff]  ;;  %v78_v19 = vld [vmem:[%s4105_s0 + $0x1d8] sm:$0xff]  ;;  %v77_v23 = vld [vmem:[%s4105_s0 + $0x1d0] sm:$0xff] }
   0x9   :  { %2407 = vmatpush.xpose.msk.msra.mxu3 %vm285_vm0, %v81_v7  ;;  %v28_v24 = vld [vmem:[%s4105_s0 + $0x48] sm:$0xff]  ;;  %v27_v28 = vld [vmem:[%s4105_s0 + $0x40] sm:$0xff]  ;;  %v26_v32 = vld [vmem:[%s4105_s0 + $0x38] sm:$0xff] }
   0xa   :  { %2354 = vmatpush.xpose.msk.msra.mxu0 %vm285_vm0, %v32_v8  ;;  %v44_v25 = vld [vmem:[%s4105_s0 + $0xc8] sm:$0xff]  ;;  %v43_v29 = vld [vmem:[%s4105_s0 + $0xc0] sm:$0xff]  ;;  %v42_v33 = vld [vmem:[%s4105_s0 + $0xb8] sm:$0xff] }
   0xb   :  { %2372 = vmatpush.xpose.msk.msra.mxu1 %vm285_vm0, %v48_v9  ;;  %v60_v26 = vld [vmem:[%s4105_s0 + $0x148] sm:$0xff]  ;;  %v59_v30 = vld [vmem:[%s4105_s0 + $0x140] sm:$0xff]  ;;  %v58_v34 = vld [vmem:[%s4105_s0 + $0x138] sm:$0xff] }
   0xc   :  { %2390 = vmatpush.xpose.msk.msra.mxu2 %vm285_vm0, %v64_v10  ;;  %v76_v27 = vld [vmem:[%s4105_s0 + $0x1c8] sm:$0xff]  ;;  %v75_v31 = vld [vmem:[%s4105_s0 + $0x1c0] sm:$0xff]  ;;  %v74_v35 = vld [vmem:[%s4105_s0 + $0x1b8] sm:$0xff] }
   0xd   :  { %2408 = vmatpush.xpose.msk.msra.mxu3 %vm285_vm0, %v80_v11  ;;  %v25_v36 = vld [vmem:[%s4105_s0 + $0x30] sm:$0xff]  ;;  %v24_v40 = vld [vmem:[%s4105_s0 + $0x28] sm:$0xff]  ;;  %v23_v44 = vld [vmem:[%s4105_s0 + $0x20] sm:$0xff] }
   0xe   :  { %2355 = vmatpush.xpose.msk.msra.mxu0 %vm285_vm0, %v31_v12  ;;  %v41_v37 = vld [vmem:[%s4105_s0 + $0xb0] sm:$0xff]  ;;  %v40_v41 = vld [vmem:[%s4105_s0 + $0xa8] sm:$0xff]  ;;  %v39_v45 = vld [vmem:[%s4105_s0 + $0xa0] sm:$0xff] }
   0xf   :  { %2373 = vmatpush.xpose.msk.msra.mxu1 %vm285_vm0, %v47_v13  ;;  %v57_v38 = vld [vmem:[%s4105_s0 + $0x130] sm:$0xff]  ;;  %v56_v42 = vld [vmem:[%s4105_s0 + $0x128] sm:$0xff]  ;;  %v55_v46 = vld [vmem:[%s4105_s0 + $0x120] sm:$0xff] }
  0x10   :  { %2391 = vmatpush.xpose.msk.msra.mxu2 %vm285_vm0, %v63_v14  ;;  %v73_v39 = vld [vmem:[%s4105_s0 + $0x1b0] sm:$0xff]  ;;  %v72_v43 = vld [vmem:[%s4105_s0 + $0x1a8] sm:$0xff]  ;;  %v71_v47 = vld [vmem:[%s4105_s0 + $0x1a0] sm:$0xff] }
  0x11   :  { %2409 = vmatpush.xpose.msk.msra.mxu3 %vm285_vm0, %v79_v15  ;;  %v22_v48 = vld [vmem:[%s4105_s0 + $0x18] sm:$0xff]  ;;  %v21_v52 = vld [vmem:[%s4105_s0 + $0x10] sm:$0xff]  ;;  %v20_v56 = vld [vmem:[%s4105_s0 + $0x8] sm:$0xff] }
  0x12   :  { %2356 = vmatpush.xpose.msk.msra.mxu0 %vm285_vm0, %v30_v16  ;;  %v38_v49 = vld [vmem:[%s4105_s0 + $0x98] sm:$0xff]  ;;  %v37_v53 = vld [vmem:[%s4105_s0 + $0x90] sm:$0xff]  ;;  %v36_v57 = vld [vmem:[%s4105_s0 + $0x88] sm:$0xff] }
  0x13   :  { %2374 = vmatpush.xpose.msk.msra.mxu1 %vm285_vm0, %v46_v17  ;;  %v54_v50 = vld [vmem:[%s4105_s0 + $0x118] sm:$0xff]  ;;  %v53_v54 = vld [vmem:[%s4105_s0 + $0x110] sm:$0xff]  ;;  %v52_v58 = vld [vmem:[%s4105_s0 + $0x108] sm:$0xff] }
  0x14   :  { %2392 = vmatpush.xpose.msk.msra.mxu2 %vm285_vm0, %v62_v18  ;;  %v70_v51 = vld [vmem:[%s4105_s0 + $0x198] sm:$0xff]  ;;  %v69_v55 = vld [vmem:[%s4105_s0 + $0x190] sm:$0xff]  ;;  %v68_v59 = vld [vmem:[%s4105_s0 + $0x188] sm:$0xff] }
  0x15   :  { %2410 = vmatpush.xpose.msk.msra.mxu3 %vm285_vm0, %v78_v19  ;;  %v19_v60 = vld [vmem:[%s4105_s0] sm:$0xff]  ;;  %v98_v0 = vld [vmem:[%s4105_s0 + $0x278] sm:$0xff]  ;;  %v97_v4 = vld [vmem:[%s4105_s0 + $0x270] sm:$0xff] }
  0x16   :  { %2357 = vmatpush.xpose.msk.msra.mxu0 %vm285_vm0, %v29_v20  ;;  %v35_v61 = vld [vmem:[%s4105_s0 + $0x80] sm:$0xff]  ;;  %v114_v1 = vld [vmem:[%s4105_s0 + $0x2f8] sm:$0xff]  ;;  %v113_v5 = vld [vmem:[%s4105_s0 + $0x2f0] sm:$0xff] }
  0x17   :  { %2375 = vmatpush.xpose.msk.msra.mxu1 %vm285_vm0, %v45_v21  ;;  %v51_v62 = vld [vmem:[%s4105_s0 + $0x100] sm:$0xff]  ;;  %v130_v2 = vld [vmem:[%s4105_s0 + $0x378] sm:$0xff]  ;;  %v129_v6 = vld [vmem:[%s4105_s0 + $0x370] sm:$0xff] }
  0x18   :  { %2393 = vmatpush.xpose.msk.msra.mxu2 %vm285_vm0, %v61_v22  ;;  %v67_v63 = vld [vmem:[%s4105_s0 + $0x180] sm:$0xff]  ;;  %v146_v3 = vld [vmem:[%s4105_s0 + $0x3f8] sm:$0xff]  ;;  %v145_v7 = vld [vmem:[%s4105_s0 + $0x3f0] sm:$0xff] }
  0x19   :  { %2411 = vmatpush.xpose.msk.msra.mxu3 %vm285_vm0, %v77_v23  ;;  %v96_v8 = vld [vmem:[%s4105_s0 + $0x268] sm:$0xff]  ;;  %v95_v12 = vld [vmem:[%s4105_s0 + $0x260] sm:$0xff]  ;;  %v94_v16 = vld [vmem:[%s4105_s0 + $0x258] sm:$0xff] }
  0x1a   :  { %2358 = vmatpush.xpose.msk.msra.mxu0 %vm285_vm0, %v28_v24  ;;  %v112_v9 = vld [vmem:[%s4105_s0 + $0x2e8] sm:$0xff]  ;;  %v111_v13 = vld [vmem:[%s4105_s0 + $0x2e0] sm:$0xff]  ;;  %v110_v17 = vld [vmem:[%s4105_s0 + $0x2d8] sm:$0xff] }
  0x1b   :  { %2376 = vmatpush.xpose.msk.msra.mxu1 %vm285_vm0, %v44_v25  ;;  %v128_v10 = vld [vmem:[%s4105_s0 + $0x368] sm:$0xff]  ;;  %v127_v14 = vld [vmem:[%s4105_s0 + $0x360] sm:$0xff]  ;;  %v126_v18 = vld [vmem:[%s4105_s0 + $0x358] sm:$0xff] }
  0x1c   :  { %2394 = vmatpush.xpose.msk.msra.mxu2 %vm285_vm0, %v60_v26  ;;  %v144_v11 = vld [vmem:[%s4105_s0 + $0x3e8] sm:$0xff]  ;;  %v143_v15 = vld [vmem:[%s4105_s0 + $0x3e0] sm:$0xff]  ;;  %v142_v19 = vld [vmem:[%s4105_s0 + $0x3d8] sm:$0xff] }
  0x1d   :  { %2412 = vmatpush.xpose.msk.msra.mxu3 %vm285_vm0, %v76_v27  ;;  %v93_v20 = vld [vmem:[%s4105_s0 + $0x250] sm:$0xff]  ;;  %v3074_v22 = vld [vmem:[%s4106_s2] sm:$0xff]  ;;  %v92_v25 = vld [vmem:[%s4105_s0 + $0x248] sm:$0xff] }
  0x1e   :  { %2359 = vmatpush.xpose.msk.msra.mxu0 %vm285_vm0, %v27_v28  ;;  %v109_v21 = vld [vmem:[%s4105_s0 + $0x2d0] sm:$0xff]  ;;  %v108_v26 = vld [vmem:[%s4105_s0 + $0x2c8] sm:$0xff] }
  0x1f   :  { %2377 = vmatpush.xpose.msk.msra.mxu1 %vm285_vm0, %v43_v29  ;;  %v125_v23 = vld [vmem:[%s4105_s0 + $0x350] sm:$0xff]  ;;  %v124_v27 = vld [vmem:[%s4105_s0 + $0x348] sm:$0xff]  ;;  %v91_v29 = vld [vmem:[%s4105_s0 + $0x240] sm:$0xff] }
  0x20   :  { %2395 = vmatpush.xpose.msk.msra.mxu2 %vm285_vm0, %v59_v30  ;;  %v141_v24 = vld [vmem:[%s4105_s0 + $0x3d0] sm:$0xff]  ;;  %v140_v28 = vld [vmem:[%s4105_s0 + $0x3c8] sm:$0xff]  ;;  %v107_v30 = vld [vmem:[%s4105_s0 + $0x2c0] sm:$0xff] }
  0x21   :  { %2413 = vmatpush.xpose.msk.msra.mxu3 %vm285_vm0, %v75_v31  ;;  %v3119_v31 = vld [vmem:[%s4106_s2 + $0x8] sm:$0xff] }
  0x22   :  { %2360 = vmatpush.xpose.msk.msra.mxu0 %vm285_vm0, %v26_v32  ;;  %v123_v32 = vld [vmem:[%s4105_s0 + $0x340] sm:$0xff] }
  0x23   :  { %2378 = vmatpush.xpose.msk.msra.mxu1 %vm285_vm0, %v42_v33  ;;  %v139_v33 = vld [vmem:[%s4105_s0 + $0x3c0] sm:$0xff] }
  0x24   :  { %2396 = vmatpush.xpose.msk.msra.mxu2 %vm285_vm0, %v58_v34  ;;  %v90_v34 = vld [vmem:[%s4105_s0 + $0x238] sm:$0xff] }
  0x25   :  { %2414 = vmatpush.xpose.msk.msra.mxu3 %vm285_vm0, %v74_v35  ;;  %v106_v35 = vld [vmem:[%s4105_s0 + $0x2b8] sm:$0xff] }
  0x26   :  { %2361 = vmatpush.xpose.msk.msra.mxu0 %vm285_vm0, %v25_v36  ;;  %v122_v36 = vld [vmem:[%s4105_s0 + $0x338] sm:$0xff] }
  0x27   :  { %2379 = vmatpush.xpose.msk.msra.mxu1 %vm285_vm0, %v41_v37  ;;  %v138_v37 = vld [vmem:[%s4105_s0 + $0x3b8] sm:$0xff] }
  0x28   :  { %2397 = vmatpush.xpose.msk.msra.mxu2 %vm285_vm0, %v57_v38  ;;  %v89_v38 = vld [vmem:[%s4105_s0 + $0x230] sm:$0xff] }
  0x29   :  { %2415 = vmatpush.xpose.msk.msra.mxu3 %vm285_vm0, %v73_v39  ;;  %v105_v39 = vld [vmem:[%s4105_s0 + $0x2b0] sm:$0xff] }
  0x2a   :  { %2362 = vmatpush.xpose.msk.msra.mxu0 %vm285_vm0, %v24_v40  ;;  %v121_v40 = vld [vmem:[%s4105_s0 + $0x330] sm:$0xff] }
  0x2b   :  { %2380 = vmatpush.xpose.msk.msra.mxu1 %vm285_vm0, %v40_v41  ;;  %v137_v41 = vld [vmem:[%s4105_s0 + $0x3b0] sm:$0xff] }
  0x2c   :  { %2398 = vmatpush.xpose.msk.msra.mxu2 %vm285_vm0, %v56_v42  ;;  %v88_v42 = vld [vmem:[%s4105_s0 + $0x228] sm:$0xff] }
  0x2d   :  { %2416 = vmatpush.xpose.msk.msra.mxu3 %vm285_vm0, %v72_v43  ;;  %v104_v43 = vld [vmem:[%s4105_s0 + $0x2a8] sm:$0xff] }
  0x2e   :  { %2363 = vmatpush.xpose.msk.msra.mxu0 %vm285_vm0, %v23_v44  ;;  %v120_v44 = vld [vmem:[%s4105_s0 + $0x328] sm:$0xff] }
  0x2f   :  { %2381 = vmatpush.xpose.msk.msra.mxu1 %vm285_vm0, %v39_v45  ;;  %v136_v45 = vld [vmem:[%s4105_s0 + $0x3a8] sm:$0xff] }
  0x30   :  { %2399 = vmatpush.xpose.msk.msra.mxu2 %vm285_vm0, %v55_v46  ;;  %v2708_v46 = vmov 16  }
  0x31   :  { %2417 = vmatpush.xpose.msk.msra.mxu3 %vm285_vm0, %v71_v47  ;;  %2693 = vset.pattern.permute.xlu0 %v2708_v46  ;;  %v87_v47 = vld [vmem:[%s4105_s0 + $0x220] sm:$0xff] }
  0x32   :  { %2364 = vmatpush.xpose.msk.msra.mxu0 %vm285_vm0, %v22_v48  ;;  %2694 = vset.pattern.permute.xlu1 %v2708_v46  ;;  %v103_v48 = vld [vmem:[%s4105_s0 + $0x2a0] sm:$0xff] }
  0x33   :  { %2382 = vmatpush.xpose.msk.msra.mxu1 %vm285_vm0, %v38_v49  ;;  %282 = vperm.xlu0 %2693, %v3119_v31   ;;  %v119_v49 = vld [vmem:[%s4105_s0 + $0x320] sm:$0xff] }
  0x34   :  { %2400 = vmatpush.xpose.msk.msra.mxu2 %vm285_vm0, %v54_v50  ;;  %2695 = vset.pattern.permute.xlu2 %v2708_v46  ;;  %v135_v50 = vld [vmem:[%s4105_s0 + $0x3a0] sm:$0xff]  ;;  %v168_v46 = vld [vmem:[%s4105_s0 + $0x4a8] sm:$0xff] }
  0x35   :  { %2418 = vmatpush.xpose.msk.msra.mxu3 %vm285_vm0, %v70_v51  ;;  %v86_v51 = vld [vmem:[%s4105_s0 + $0x218] sm:$0xff] }
  0x36   :  { %2365 = vmatpush.xpose.msk.msra.mxu0 %vm285_vm0, %v21_v52  ;;  %v102_v52 = vld [vmem:[%s4105_s0 + $0x298] sm:$0xff] }
  0x37   :  { %2383 = vmatpush.xpose.msk.msra.mxu1 %vm285_vm0, %v37_v53  ;;  %v118_v53 = vld [vmem:[%s4105_s0 + $0x318] sm:$0xff] }
  0x38   :  { %2401 = vmatpush.xpose.msk.msra.mxu2 %vm285_vm0, %v53_v54  ;;  %v134_v54 = vld [vmem:[%s4105_s0 + $0x398] sm:$0xff] }
  0x39   :  { %2419 = vmatpush.xpose.msk.msra.mxu3 %vm285_vm0, %v69_v55  ;;  %v85_v55 = vld [vmem:[%s4105_s0 + $0x210] sm:$0xff] }
  0x3a   :  { %2366 = vmatpush.xpose.msk.msra.mxu0 %vm285_vm0, %v20_v56  ;;  %v101_v56 = vld [vmem:[%s4105_s0 + $0x290] sm:$0xff] }
  0x3b   :  { %2384 = vmatpush.xpose.msk.msra.mxu1 %vm285_vm0, %v36_v57  ;;  %277 = vperm.xlu0 %2693, %v3074_v22   ;;  %v117_v57 = vld [vmem:[%s4105_s0 + $0x310] sm:$0xff] }
  0x3c   :  { %2402 = vmatpush.xpose.msk.msra.mxu2 %vm285_vm0, %v52_v58  ;;  %v133_v58 = vld [vmem:[%s4105_s0 + $0x390] sm:$0xff] }
  0x3d   :  { %2420 = vmatpush.xpose.msk.msra.mxu3 %vm285_vm0, %v68_v59  ;;  %v84_v59 = vld [vmem:[%s4105_s0 + $0x208] sm:$0xff] }
  0x3e   :  { %2367 = vmatpush.xpose.msk.msra.mxu0 %vm285_vm0, %v19_v60  ;;  %v100_v60 = vld [vmem:[%s4105_s0 + $0x288] sm:$0xff] }
  0x3f   :  { %2385 = vmatpush.xpose.msk.msra.mxu1 %vm285_vm0, %v35_v61  ;;  %v116_v61 = vld [vmem:[%s4105_s0 + $0x308] sm:$0xff] }
  0x40   :  { %2403 = vmatpush.xpose.msk.msra.mxu2 %vm285_vm0, %v51_v62  ;;  %v132_v62 = vld [vmem:[%s4105_s0 + $0x388] sm:$0xff] }
  0x41   :  { %2421 = vmatpush.xpose.msk.msra.mxu3 %vm285_vm0, %v67_v63  ;;  %2368 = vmatmul.msk.f32.vlgmr.msra.gmra.mxu0 %vm285_vm0, %v3074_v22  ;;  %v83_v63 = vld [vmem:[%s4105_s0 + $0x200] sm:$0xff] }
  0x42   :  { %2424 = vmatpush.xpose.msk.msrb.mxu0 %vm285_vm0, %v98_v0  ;;  %2386 = vmatmul.msk.f32.vlgmr.msra.gmra.mxu1 %vm285_vm0, %v3074_v22  ;;  %v99_v0 = vld [vmem:[%s4105_s0 + $0x280] sm:$0xff] }
  0x43   :  { %2442 = vmatpush.xpose.msk.msrb.mxu1 %vm285_vm0, %v114_v1  ;;  %2404 = vmatmul.msk.f32.vlgmr.msra.gmra.mxu2 %vm285_vm0, %v3074_v22  ;;  %v115_v1 = vld [vmem:[%s4105_s0 + $0x300] sm:$0xff] }
  0x44   :  { %2460 = vmatpush.xpose.msk.msrb.mxu2 %vm285_vm0, %v130_v2  ;;  %2422 = vmatmul.msk.f32.vlgmr.msra.gmra.mxu3 %vm285_vm0, %v3074_v22  ;;  %v131_v2 = vld [vmem:[%s4105_s0 + $0x380] sm:$0xff] }
  0x45   :  { %2478 = vmatpush.xpose.msk.msrb.mxu3 %vm285_vm0, %v146_v3  ;;  %v162_v3 = vld [vmem:[%s4105_s0 + $0x478] sm:$0xff] }
  0x46   :  { %2425 = vmatpush.xpose.msk.msrb.mxu0 %vm285_vm0, %v97_v4  ;;  %v178_v4 = vld [vmem:[%s4105_s0 + $0x4f8] sm:$0xff] }
  0x47   :  { %2443 = vmatpush.xpose.msk.msrb.mxu1 %vm285_vm0, %v113_v5  ;;  %v194_v5 = vld [vmem:[%s4105_s0 + $0x578] sm:$0xff] }
  0x48   :  { %2461 = vmatpush.xpose.msk.msrb.mxu2 %vm285_vm0, %v129_v6  ;;  %v210_v6 = vld [vmem:[%s4105_s0 + $0x5f8] sm:$0xff] }
  0x49   :  { %2479 = vmatpush.xpose.msk.msrb.mxu3 %vm285_vm0, %v145_v7  ;;  %2369 = vmatmul.msk.f32.gmra.mxu0 %vm285_vm0, %v3119_v31  ;;  %v161_v7 = vld [vmem:[%s4105_s0 + $0x470] sm:$0xff] }
  0x4a   :  { %2426 = vmatpush.xpose.msk.msrb.mxu0 %vm285_vm0, %v96_v8  ;;  %2387 = vmatmul.msk.f32.gmra.mxu1 %vm285_vm0, %v3119_v31  ;;  %v177_v8 = vld [vmem:[%s4105_s0 + $0x4f0] sm:$0xff] }
  0x4b   :  { %2444 = vmatpush.xpose.msk.msrb.mxu1 %vm285_vm0, %v112_v9  ;;  %2405 = vmatmul.msk.f32.gmra.mxu2 %vm285_vm0, %v3119_v31  ;;  %v193_v9 = vld [vmem:[%s4105_s0 + $0x570] sm:$0xff] }
  0x4c   :  { %2462 = vmatpush.xpose.msk.msrb.mxu2 %vm285_vm0, %v128_v10  ;;  %2423 = vmatmul.msk.f32.gmra.mxu3 %vm285_vm0, %v3119_v31  ;;  %v209_v10 = vld [vmem:[%s4105_s0 + $0x5f0] sm:$0xff] }
  0x4d   :  { %2480 = vmatpush.xpose.msk.msrb.mxu3 %vm285_vm0, %v144_v11  ;;  %v160_v11 = vld [vmem:[%s4105_s0 + $0x468] sm:$0xff] }
  0x4e   :  { %2427 = vmatpush.xpose.msk.msrb.mxu0 %vm285_vm0, %v95_v12  ;;  %v176_v12 = vld [vmem:[%s4105_s0 + $0x4e8] sm:$0xff] }
  0x4f   :  { %2445 = vmatpush.xpose.msk.msrb.mxu1 %vm285_vm0, %v111_v13  ;;  %v192_v13 = vld [vmem:[%s4105_s0 + $0x568] sm:$0xff] }
  0x50   :  { %2463 = vmatpush.xpose.msk.msrb.mxu2 %vm285_vm0, %v127_v14  ;;  %v208_v14 = vld [vmem:[%s4105_s0 + $0x5e8] sm:$0xff] }
  0x51   :  { %2481 = vmatpush.xpose.msk.msrb.mxu3 %vm285_vm0, %v143_v15  ;;  %v159_v15 = vld [vmem:[%s4105_s0 + $0x460] sm:$0xff] }
  0x52   :  { %2428 = vmatpush.xpose.msk.msrb.mxu0 %vm285_vm0, %v94_v16  ;;  %v175_v16 = vld [vmem:[%s4105_s0 + $0x4e0] sm:$0xff] }
  0x53   :  { %2446 = vmatpush.xpose.msk.msrb.mxu1 %vm285_vm0, %v110_v17  ;;  %v191_v17 = vld [vmem:[%s4105_s0 + $0x560] sm:$0xff] }
  0x54   :  { %2464 = vmatpush.xpose.msk.msrb.mxu2 %vm285_vm0, %v126_v18  ;;  %v207_v18 = vld [vmem:[%s4105_s0 + $0x5e0] sm:$0xff] }
  0x55   :  { %2482 = vmatpush.xpose.msk.msrb.mxu3 %vm285_vm0, %v142_v19  ;;  %v158_v19 = vld [vmem:[%s4105_s0 + $0x458] sm:$0xff] }
  0x56   :  { %2429 = vmatpush.xpose.msk.msrb.mxu0 %vm285_vm0, %v93_v20  ;;  %v174_v20 = vld [vmem:[%s4105_s0 + $0x4d8] sm:$0xff] }
  0x57   :  { %2447 = vmatpush.xpose.msk.msrb.mxu1 %vm285_vm0, %v109_v21  ;;  %v190_v21 = vld [vmem:[%s4105_s0 + $0x558] sm:$0xff] }
  0x58   :  { %2465 = vmatpush.xpose.msk.msrb.mxu2 %vm285_vm0, %v125_v23  ;;  %v206_v23 = vld [vmem:[%s4105_s0 + $0x5d8] sm:$0xff] }
  0x59   :  { %2483 = vmatpush.xpose.msk.msrb.mxu3 %vm285_vm0, %v141_v24  ;;  %v157_v24 = vld [vmem:[%s4105_s0 + $0x450] sm:$0xff] }
  0x5a   :  { %2430 = vmatpush.xpose.msk.msrb.mxu0 %vm285_vm0, %v92_v25  ;;  %v173_v25 = vld [vmem:[%s4105_s0 + $0x4d0] sm:$0xff] }
  0x5b   :  { %2448 = vmatpush.xpose.msk.msrb.mxu1 %vm285_vm0, %v108_v26  ;;  %v189_v26 = vld [vmem:[%s4105_s0 + $0x550] sm:$0xff] }
  0x5c   :  { %2466 = vmatpush.xpose.msk.msrb.mxu2 %vm285_vm0, %v124_v27  ;;  %v205_v27 = vld [vmem:[%s4105_s0 + $0x5d0] sm:$0xff] }
  0x5d   :  { %2484 = vmatpush.xpose.msk.msrb.mxu3 %vm285_vm0, %v140_v28  ;;  %v156_v28 = vld [vmem:[%s4105_s0 + $0x448] sm:$0xff] }
  0x5e   :  { %2431 = vmatpush.xpose.msk.msrb.mxu0 %vm285_vm0, %v91_v29  ;;  %v172_v29 = vld [vmem:[%s4105_s0 + $0x4c8] sm:$0xff] }
  0x5f   :  { %2449 = vmatpush.xpose.msk.msrb.mxu1 %vm285_vm0, %v107_v30  ;;  %v188_v30 = vld [vmem:[%s4105_s0 + $0x548] sm:$0xff] }
  0x60   :  { %2467 = vmatpush.xpose.msk.msrb.mxu2 %vm285_vm0, %v123_v32  ;;  %v204_v32 = vld [vmem:[%s4105_s0 + $0x5c8] sm:$0xff] }
  0x61   :  { %2485 = vmatpush.xpose.msk.msrb.mxu3 %vm285_vm0, %v139_v33  ;;  %v155_v33 = vld [vmem:[%s4105_s0 + $0x440] sm:$0xff] }
  0x62   :  { %2432 = vmatpush.xpose.msk.msrb.mxu0 %vm285_vm0, %v90_v34  ;;  %v171_v34 = vld [vmem:[%s4105_s0 + $0x4c0] sm:$0xff] }
  0x63   :  { %2450 = vmatpush.xpose.msk.msrb.mxu1 %vm285_vm0, %v106_v35  ;;  %v187_v35 = vld [vmem:[%s4105_s0 + $0x540] sm:$0xff] }
  0x64   :  { %2468 = vmatpush.xpose.msk.msrb.mxu2 %vm285_vm0, %v122_v36  ;;  %v203_v36 = vld [vmem:[%s4105_s0 + $0x5c0] sm:$0xff] }
  0x65   :  { %2486 = vmatpush.xpose.msk.msrb.mxu3 %vm285_vm0, %v138_v37  ;;  %v154_v37 = vld [vmem:[%s4105_s0 + $0x438] sm:$0xff] }
  0x66   :  { %2433 = vmatpush.xpose.msk.msrb.mxu0 %vm285_vm0, %v89_v38  ;;  %v170_v38 = vld [vmem:[%s4105_s0 + $0x4b8] sm:$0xff] }
  0x67   :  { %2451 = vmatpush.xpose.msk.msrb.mxu1 %vm285_vm0, %v105_v39  ;;  %v186_v39 = vld [vmem:[%s4105_s0 + $0x538] sm:$0xff] }
  0x68   :  { %2469 = vmatpush.xpose.msk.msrb.mxu2 %vm285_vm0, %v121_v40  ;;  %v202_v40 = vld [vmem:[%s4105_s0 + $0x5b8] sm:$0xff] }
  0x69   :  { %2487 = vmatpush.xpose.msk.msrb.mxu3 %vm285_vm0, %v137_v41  ;;  %v153_v41 = vld [vmem:[%s4105_s0 + $0x430] sm:$0xff] }
  0x6a   :  { %2434 = vmatpush.xpose.msk.msrb.mxu0 %vm285_vm0, %v88_v42  ;;  %v169_v42 = vld [vmem:[%s4105_s0 + $0x4b0] sm:$0xff] }
  0x6b   :  { %2452 = vmatpush.xpose.msk.msrb.mxu1 %vm285_vm0, %v104_v43  ;;  %v185_v43 = vld [vmem:[%s4105_s0 + $0x530] sm:$0xff] }
  0x6c   :  { %2470 = vmatpush.xpose.msk.msrb.mxu2 %vm285_vm0, %v120_v44  ;;  %v201_v44 = vld [vmem:[%s4105_s0 + $0x5b0] sm:$0xff] }
  0x6d   :  { %2488 = vmatpush.xpose.msk.msrb.mxu3 %vm285_vm0, %v136_v45  ;;  %v152_v45 = vld [vmem:[%s4105_s0 + $0x428] sm:$0xff] }
  0x6e   :  { %2435 = vmatpush.xpose.msk.msrb.mxu0 %vm285_vm0, %v87_v47  ;;  %v184_v47 = vld [vmem:[%s4105_s0 + $0x528] sm:$0xff] }
  0x6f   :  { %2453 = vmatpush.xpose.msk.msrb.mxu1 %vm285_vm0, %v103_v48  ;;  %v200_v48 = vld [vmem:[%s4105_s0 + $0x5a8] sm:$0xff] }
  0x70   :  { %2471 = vmatpush.xpose.msk.msrb.mxu2 %vm285_vm0, %v119_v49  ;;  %v151_v49 = vld [vmem:[%s4105_s0 + $0x420] sm:$0xff] }
  0x71   :  { %2489 = vmatpush.xpose.msk.msrb.mxu3 %vm285_vm0, %v135_v50  ;;  %v167_v50 = vld [vmem:[%s4105_s0 + $0x4a0] sm:$0xff] }
  0x72   :  { %2436 = vmatpush.xpose.msk.msrb.mxu0 %vm285_vm0, %v86_v51  ;;  %v183_v51 = vld [vmem:[%s4105_s0 + $0x520] sm:$0xff] }
  0x73   :  { %2454 = vmatpush.xpose.msk.msrb.mxu1 %vm285_vm0, %v102_v52  ;;  %v199_v52 = vld [vmem:[%s4105_s0 + $0x5a0] sm:$0xff] }
  0x74   :  { %2472 = vmatpush.xpose.msk.msrb.mxu2 %vm285_vm0, %v118_v53  ;;  %v150_v53 = vld [vmem:[%s4105_s0 + $0x418] sm:$0xff] }
  0x75   :  { %2490 = vmatpush.xpose.msk.msrb.mxu3 %vm285_vm0, %v134_v54  ;;  %v166_v54 = vld [vmem:[%s4105_s0 + $0x498] sm:$0xff] }
  0x76   :  { %2437 = vmatpush.xpose.msk.msrb.mxu0 %vm285_vm0, %v85_v55  ;;  %v182_v55 = vld [vmem:[%s4105_s0 + $0x518] sm:$0xff] }
  0x77   :  { %2455 = vmatpush.xpose.msk.msrb.mxu1 %vm285_vm0, %v101_v56  ;;  %v198_v56 = vld [vmem:[%s4105_s0 + $0x598] sm:$0xff] }
  0x78   :  { %2473 = vmatpush.xpose.msk.msrb.mxu2 %vm285_vm0, %v117_v57  ;;  %v149_v57 = vld [vmem:[%s4105_s0 + $0x410] sm:$0xff] }
  0x79   :  { %2491 = vmatpush.xpose.msk.msrb.mxu3 %vm285_vm0, %v133_v58  ;;  %v165_v58 = vld [vmem:[%s4105_s0 + $0x490] sm:$0xff] }
  0x7a   :  { %2438 = vmatpush.xpose.msk.msrb.mxu0 %vm285_vm0, %v84_v59  ;;  %v181_v59 = vld [vmem:[%s4105_s0 + $0x510] sm:$0xff] }
  0x7b   :  { %2456 = vmatpush.xpose.msk.msrb.mxu1 %vm285_vm0, %v100_v60  ;;  %v197_v60 = vld [vmem:[%s4105_s0 + $0x590] sm:$0xff] }
  0x7c   :  { %2474 = vmatpush.xpose.msk.msrb.mxu2 %vm285_vm0, %v116_v61  ;;  %v148_v61 = vld [vmem:[%s4105_s0 + $0x408] sm:$0xff] }
  0x7d   :  { %2492 = vmatpush.xpose.msk.msrb.mxu3 %vm285_vm0, %v132_v62  ;;  %v164_v62 = vld [vmem:[%s4105_s0 + $0x488] sm:$0xff] }
  0x7e   :  { %2439 = vmatpush.xpose.msk.msrb.mxu0 %vm285_vm0, %v83_v63  ;;  %v180_v63 = vld [vmem:[%s4105_s0 + $0x508] sm:$0xff] }
  0x7f   :  { %2457 = vmatpush.xpose.msk.msrb.mxu1 %vm285_vm0, %v99_v0  ;;  %v196_v0 = vld [vmem:[%s4105_s0 + $0x588] sm:$0xff] }
  0x80   :  { %2475 = vmatpush.xpose.msk.msrb.mxu2 %vm285_vm0, %v115_v1  ;;  %v147_v1 = vld [vmem:[%s4105_s0 + $0x400] sm:$0xff] }
  0x81   :  { %2493 = vmatpush.xpose.msk.msrb.mxu3 %vm285_vm0, %v131_v2  ;;  %2440 = vmatmul.msk.f32.vlgmr.msrb.gmra.mxu0 %vm285_vm0, %v3074_v22  ;;  %v163_v2 = vld [vmem:[%s4105_s0 + $0x480] sm:$0xff] }
  0x82   :  { %2496 = vmatpush.xpose.msk.msra.mxu0 %vm285_vm0, %v162_v3  ;;  %2458 = vmatmul.msk.f32.vlgmr.msrb.gmra.mxu1 %vm285_vm0, %v3074_v22  ;;  %v179_v3 = vld [vmem:[%s4105_s0 + $0x500] sm:$0xff] }
  0x83   :  { %2514 = vmatpush.xpose.msk.msra.mxu1 %vm285_vm0, %v178_v4  ;;  %2476 = vmatmul.msk.f32.vlgmr.msrb.gmra.mxu2 %vm285_vm0, %v3074_v22  ;;  %v195_v4 = vld [vmem:[%s4105_s0 + $0x580] sm:$0xff] }
  0x84   :  { %2532 = vmatpush.xpose.msk.msra.mxu2 %vm285_vm0, %v194_v5  ;;  %2494 = vmatmul.msk.f32.vlgmr.msrb.gmra.mxu3 %vm285_vm0, %v3074_v22  ;;  %v226_v5 = vld [vmem:[%s4105_s0 + $0x678] sm:$0xff] }
  0x85   :  { %2550 = vmatpush.xpose.msk.msra.mxu3 %vm285_vm0, %v210_v6  ;;  %v242_v6 = vld [vmem:[%s4105_s0 + $0x6f8] sm:$0xff] }
  0x86   :  { %2497 = vmatpush.xpose.msk.msra.mxu0 %vm285_vm0, %v161_v7  ;;  %v258_v7 = vld [vmem:[%s4105_s0 + $0x778] sm:$0xff] }
  0x87   :  { %2515 = vmatpush.xpose.msk.msra.mxu1 %vm285_vm0, %v177_v8  ;;  %v274_v8 = vld [vmem:[%s4105_s0 + $0x7f8] sm:$0xff] }
  0x88   :  { %2533 = vmatpush.xpose.msk.msra.mxu2 %vm285_vm0, %v193_v9  ;;  %v225_v9 = vld [vmem:[%s4105_s0 + $0x670] sm:$0xff] }
  0x89   :  { %2551 = vmatpush.xpose.msk.msra.mxu3 %vm285_vm0, %v209_v10  ;;  %2441 = vmatmul.msk.f32.gmra.mxu0 %vm285_vm0, %v3119_v31  ;;  %v241_v10 = vld [vmem:[%s4105_s0 + $0x6f0] sm:$0xff] }
  0x8a   :  { %2498 = vmatpush.xpose.msk.msra.mxu0 %vm285_vm0, %v160_v11  ;;  %2459 = vmatmul.msk.f32.gmra.mxu1 %vm285_vm0, %v3119_v31  ;;  %v257_v11 = vld [vmem:[%s4105_s0 + $0x770] sm:$0xff] }
  0x8b   :  { %2516 = vmatpush.xpose.msk.msra.mxu1 %vm285_vm0, %v176_v12  ;;  %2477 = vmatmul.msk.f32.gmra.mxu2 %vm285_vm0, %v3119_v31  ;;  %v273_v12 = vld [vmem:[%s4105_s0 + $0x7f0] sm:$0xff] }
  0x8c   :  { %2534 = vmatpush.xpose.msk.msra.mxu2 %vm285_vm0, %v192_v13  ;;  %2495 = vmatmul.msk.f32.gmra.mxu3 %vm285_vm0, %v3119_v31  ;;  %v224_v13 = vld [vmem:[%s4105_s0 + $0x668] sm:$0xff] }
  0x8d   :  { %2552 = vmatpush.xpose.msk.msra.mxu3 %vm285_vm0, %v208_v14  ;;  %v240_v14 = vld [vmem:[%s4105_s0 + $0x6e8] sm:$0xff] }
  0x8e   :  { %2499 = vmatpush.xpose.msk.msra.mxu0 %vm285_vm0, %v159_v15  ;;  %v256_v15 = vld [vmem:[%s4105_s0 + $0x768] sm:$0xff] }
  0x8f   :  { %2517 = vmatpush.xpose.msk.msra.mxu1 %vm285_vm0, %v175_v16  ;;  %v272_v16 = vld [vmem:[%s4105_s0 + $0x7e8] sm:$0xff] }
  0x90   :  { %2535 = vmatpush.xpose.msk.msra.mxu2 %vm285_vm0, %v191_v17  ;;  %v223_v17 = vld [vmem:[%s4105_s0 + $0x660] sm:$0xff] }
  0x91   :  { %2553 = vmatpush.xpose.msk.msra.mxu3 %vm285_vm0, %v207_v18  ;;  %v239_v18 = vld [vmem:[%s4105_s0 + $0x6e0] sm:$0xff] }
  0x92   :  { %2500 = vmatpush.xpose.msk.msra.mxu0 %vm285_vm0, %v158_v19  ;;  %v255_v19 = vld [vmem:[%s4105_s0 + $0x760] sm:$0xff] }
  0x93   :  { %2518 = vmatpush.xpose.msk.msra.mxu1 %vm285_vm0, %v174_v20  ;;  %v271_v20 = vld [vmem:[%s4105_s0 + $0x7e0] sm:$0xff] }
  0x94   :  { %2536 = vmatpush.xpose.msk.msra.mxu2 %vm285_vm0, %v190_v21  ;;  %v222_v21 = vld [vmem:[%s4105_s0 + $0x658] sm:$0xff] }
  0x95   :  { %2554 = vmatpush.xpose.msk.msra.mxu3 %vm285_vm0, %v206_v23  ;;  %v238_v23 = vld [vmem:[%s4105_s0 + $0x6d8] sm:$0xff] }
  0x96   :  { %2501 = vmatpush.xpose.msk.msra.mxu0 %vm285_vm0, %v157_v24  ;;  %v254_v24 = vld [vmem:[%s4105_s0 + $0x758] sm:$0xff] }
  0x97   :  { %2519 = vmatpush.xpose.msk.msra.mxu1 %vm285_vm0, %v173_v25  ;;  %v270_v25 = vld [vmem:[%s4105_s0 + $0x7d8] sm:$0xff] }
  0x98   :  { %2537 = vmatpush.xpose.msk.msra.mxu2 %vm285_vm0, %v189_v26  ;;  %v221_v26 = vld [vmem:[%s4105_s0 + $0x650] sm:$0xff] }
  0x99   :  { %2555 = vmatpush.xpose.msk.msra.mxu3 %vm285_vm0, %v205_v27  ;;  %v237_v27 = vld [vmem:[%s4105_s0 + $0x6d0] sm:$0xff] }
  0x9a   :  { %2502 = vmatpush.xpose.msk.msra.mxu0 %vm285_vm0, %v156_v28  ;;  %v253_v28 = vld [vmem:[%s4105_s0 + $0x750] sm:$0xff] }
  0x9b   :  { %2520 = vmatpush.xpose.msk.msra.mxu1 %vm285_vm0, %v172_v29  ;;  %v269_v29 = vld [vmem:[%s4105_s0 + $0x7d0] sm:$0xff] }
  0x9c   :  { %2538 = vmatpush.xpose.msk.msra.mxu2 %vm285_vm0, %v188_v30  ;;  %v220_v30 = vld [vmem:[%s4105_s0 + $0x648] sm:$0xff] }
  0x9d   :  { %2556 = vmatpush.xpose.msk.msra.mxu3 %vm285_vm0, %v204_v32  ;;  %v236_v32 = vld [vmem:[%s4105_s0 + $0x6c8] sm:$0xff] }
  0x9e   :  { %2503 = vmatpush.xpose.msk.msra.mxu0 %vm285_vm0, %v155_v33  ;;  %v252_v33 = vld [vmem:[%s4105_s0 + $0x748] sm:$0xff] }
  0x9f   :  { %2521 = vmatpush.xpose.msk.msra.mxu1 %vm285_vm0, %v171_v34  ;;  %v268_v34 = vld [vmem:[%s4105_s0 + $0x7c8] sm:$0xff] }
  0xa0   :  { %2539 = vmatpush.xpose.msk.msra.mxu2 %vm285_vm0, %v187_v35  ;;  %v219_v35 = vld [vmem:[%s4105_s0 + $0x640] sm:$0xff] }
  0xa1   :  { %2557 = vmatpush.xpose.msk.msra.mxu3 %vm285_vm0, %v203_v36  ;;  %v235_v36 = vld [vmem:[%s4105_s0 + $0x6c0] sm:$0xff] }
  0xa2   :  { %2504 = vmatpush.xpose.msk.msra.mxu0 %vm285_vm0, %v154_v37  ;;  %v251_v37 = vld [vmem:[%s4105_s0 + $0x740] sm:$0xff] }
  0xa3   :  { %2522 = vmatpush.xpose.msk.msra.mxu1 %vm285_vm0, %v170_v38  ;;  %v267_v38 = vld [vmem:[%s4105_s0 + $0x7c0] sm:$0xff] }
  0xa4   :  { %2540 = vmatpush.xpose.msk.msra.mxu2 %vm285_vm0, %v186_v39  ;;  %v218_v39 = vld [vmem:[%s4105_s0 + $0x638] sm:$0xff] }
  0xa5   :  { %2558 = vmatpush.xpose.msk.msra.mxu3 %vm285_vm0, %v202_v40  ;;  %v234_v40 = vld [vmem:[%s4105_s0 + $0x6b8] sm:$0xff] }
  0xa6   :  { %2505 = vmatpush.xpose.msk.msra.mxu0 %vm285_vm0, %v153_v41  ;;  %v250_v41 = vld [vmem:[%s4105_s0 + $0x738] sm:$0xff] }
  0xa7   :  { %2523 = vmatpush.xpose.msk.msra.mxu1 %vm285_vm0, %v169_v42  ;;  %v266_v42 = vld [vmem:[%s4105_s0 + $0x7b8] sm:$0xff] }
  0xa8   :  { %2541 = vmatpush.xpose.msk.msra.mxu2 %vm285_vm0, %v185_v43  ;;  %v217_v43 = vld [vmem:[%s4105_s0 + $0x630] sm:$0xff] }
  0xa9   :  { %2559 = vmatpush.xpose.msk.msra.mxu3 %vm285_vm0, %v201_v44  ;;  %v233_v44 = vld [vmem:[%s4105_s0 + $0x6b0] sm:$0xff] }
  0xaa   :  { %2506 = vmatpush.xpose.msk.msra.mxu0 %vm285_vm0, %v152_v45  ;;  %v249_v45 = vld [vmem:[%s4105_s0 + $0x730] sm:$0xff] }
  0xab   :  { %2524 = vmatpush.xpose.msk.msra.mxu1 %vm285_vm0, %v168_v46  ;;  %v265_v46 = vld [vmem:[%s4105_s0 + $0x7b0] sm:$0xff] }
  0xac   :  { %2542 = vmatpush.xpose.msk.msra.mxu2 %vm285_vm0, %v184_v47  ;;  %v216_v47 = vld [vmem:[%s4105_s0 + $0x628] sm:$0xff] }
  0xad   :  { %2560 = vmatpush.xpose.msk.msra.mxu3 %vm285_vm0, %v200_v48  ;;  %v232_v48 = vld [vmem:[%s4105_s0 + $0x6a8] sm:$0xff] }
  0xae   :  { %2507 = vmatpush.xpose.msk.msra.mxu0 %vm285_vm0, %v151_v49  ;;  %v248_v49 = vld [vmem:[%s4105_s0 + $0x728] sm:$0xff] }
  0xaf   :  { %2525 = vmatpush.xpose.msk.msra.mxu1 %vm285_vm0, %v167_v50  ;;  %v264_v50 = vld [vmem:[%s4105_s0 + $0x7a8] sm:$0xff] }
  0xb0   :  { %2543 = vmatpush.xpose.msk.msra.mxu2 %vm285_vm0, %v183_v51  ;;  %v215_v51 = vld [vmem:[%s4105_s0 + $0x620] sm:$0xff] }
  0xb1   :  { %2561 = vmatpush.xpose.msk.msra.mxu3 %vm285_vm0, %v199_v52  ;;  %v231_v52 = vld [vmem:[%s4105_s0 + $0x6a0] sm:$0xff] }
  0xb2   :  { %2508 = vmatpush.xpose.msk.msra.mxu0 %vm285_vm0, %v150_v53 }
  0xb3   :  { %2526 = vmatpush.xpose.msk.msra.mxu1 %vm285_vm0, %v166_v54 }
  0xb4   :  { %2544 = vmatpush.xpose.msk.msra.mxu2 %vm285_vm0, %v182_v55  ;;  %v247_v55 = vld [vmem:[%s4105_s0 + $0x720] sm:$0xff] }
  0xb5   :  { %2562 = vmatpush.xpose.msk.msra.mxu3 %vm285_vm0, %v198_v56  ;;  %v263_v56 = vld [vmem:[%s4105_s0 + $0x7a0] sm:$0xff] }
  0xb6   :  { %2509 = vmatpush.xpose.msk.msra.mxu0 %vm285_vm0, %v149_v57  ;;  %v3747_v57 = vpop.permute.xlu0 %282 }
  0xb7   :  { %2527 = vmatpush.xpose.msk.msra.mxu1 %vm285_vm0, %v165_v58  ;;  %v214_v58 = vld [vmem:[%s4105_s0 + $0x618] sm:$0xff] }
  0xb8   :  { %2545 = vmatpush.xpose.msk.msra.mxu2 %vm285_vm0, %v181_v59  ;;  %v230_v59 = vld [vmem:[%s4105_s0 + $0x698] sm:$0xff] }
  0xb9   :  { %2563 = vmatpush.xpose.msk.msra.mxu3 %vm285_vm0, %v197_v60 }
  0xba   :  { %2510 = vmatpush.xpose.msk.msra.mxu0 %vm285_vm0, %v148_v61 }
  0xbb   :  { %2528 = vmatpush.xpose.msk.msra.mxu1 %vm285_vm0, %v164_v62  ;;  %v246_v62 = vld [vmem:[%s4105_s0 + $0x718] sm:$0xff] }
  0xbc   :  { %2546 = vmatpush.xpose.msk.msra.mxu2 %vm285_vm0, %v180_v63  ;;  %v262_v63 = vld [vmem:[%s4105_s0 + $0x798] sm:$0xff] }
  0xbd   :  { %2564 = vmatpush.xpose.msk.msra.mxu3 %vm285_vm0, %v196_v0  ;;  %v213_v0 = vld [vmem:[%s4105_s0 + $0x610] sm:$0xff] }
  0xbe   :  { %2511 = vmatpush.xpose.msk.msra.mxu0 %vm285_vm0, %v147_v1  ;;  %v1075_v60 = vpop.f32.mrf.mxu0  ;;  %v229_v1 = vld [vmem:[%s4105_s0 + $0x690] sm:$0xff] }
  0xbf   :  { %2529 = vmatpush.xpose.msk.msra.mxu1 %vm285_vm0, %v163_v2  ;;  %v1098_v61 = vpop.f32.mrf.mxu1  ;;  %v245_v2 = vld [vmem:[%s4105_s0 + $0x710] sm:$0xff] }
  0xc0   :  { %2547 = vmatpush.xpose.msk.msra.mxu2 %vm285_vm0, %v179_v3  ;;  %v261_v3 = vld [vmem:[%s4105_s0 + $0x790] sm:$0xff] }
  0xc1   :  { %2565 = vmatpush.xpose.msk.msra.mxu3 %vm285_vm0, %v195_v4  ;;  %2512 = vmatmul.msk.f32.vlgmr.msra.gmra.mxu0 %vm285_vm0, %v3074_v22 }
  0xc2   :  { %2568 = vmatpush.xpose.msk.msrb.mxu0 %vm285_vm0, %v226_v5  ;;  %2530 = vmatmul.msk.f32.vlgmr.msra.gmra.mxu1 %vm285_vm0, %v3074_v22 }
  0xc3   :  { %2586 = vmatpush.xpose.msk.msrb.mxu1 %vm285_vm0, %v242_v6  ;;  %2548 = vmatmul.msk.f32.vlgmr.msra.gmra.mxu2 %vm285_vm0, %v3074_v22  ;;  %v212_v6 = vld [vmem:[%s4105_s0 + $0x608] sm:$0xff] }
  0xc4   :  { %2604 = vmatpush.xpose.msk.msrb.mxu2 %vm285_vm0, %v258_v7  ;;  %2566 = vmatmul.msk.f32.vlgmr.msra.gmra.mxu3 %vm285_vm0, %v3074_v22  ;;  %v228_v7 = vld [vmem:[%s4105_s0 + $0x688] sm:$0xff] }
  0xc5   :  { %2622 = vmatpush.xpose.msk.msrb.mxu3 %vm285_vm0, %v274_v8  ;;  %v244_v8 = vld [vmem:[%s4105_s0 + $0x708] sm:$0xff] }
  0xc6   :  { %2569 = vmatpush.xpose.msk.msrb.mxu0 %vm285_vm0, %v225_v9  ;;  %v1121_v53 = vpop.f32.mrf.mxu2  ;;  %v260_v9 = vld [vmem:[%s4105_s0 + $0x788] sm:$0xff] }
  0xc7   :  { %2587 = vmatpush.xpose.msk.msrb.mxu1 %vm285_vm0, %v241_v10  ;;  %v1144_v54 = vpop.f32.mrf.mxu3 }
  0xc8   :  { %2605 = vmatpush.xpose.msk.msrb.mxu2 %vm285_vm0, %v257_v11 }
  0xc9   :  { %2623 = vmatpush.xpose.msk.msrb.mxu3 %vm285_vm0, %v273_v12  ;;  %2513 = vmatmul.msk.f32.gmra.mxu0 %vm285_vm0, %v3119_v31  ;;  %v3797_v12 = vpop.permute.xlu0 %277 }
  0xca   :  { %2570 = vmatpush.xpose.msk.msrb.mxu0 %vm285_vm0, %v224_v13  ;;  %2531 = vmatmul.msk.f32.gmra.mxu1 %vm285_vm0, %v3119_v31  ;;  %v1078_v13 = vpop.f32.mrf.mxu0 }
  0xcb   :  { %2588 = vmatpush.xpose.msk.msrb.mxu1 %vm285_vm0, %v240_v14  ;;  %2549 = vmatmul.msk.f32.gmra.mxu2 %vm285_vm0, %v3119_v31  ;;  %v1101_v14 = vpop.f32.mrf.mxu1 }
  0xcc   :  { %2606 = vmatpush.xpose.msk.msrb.mxu2 %vm285_vm0, %v256_v15  ;;  %2567 = vmatmul.msk.f32.gmra.mxu3 %vm285_vm0, %v3119_v31  ;;  %v211_v15 = vld [vmem:[%s4105_s0 + $0x600] sm:$0xff] }
  0xcd   :  { %2624 = vmatpush.xpose.msk.msrb.mxu3 %vm285_vm0, %v272_v16  ;;  %v227_v16 = vld [vmem:[%s4105_s0 + $0x680] sm:$0xff] }
  0xce   :  { %2571 = vmatpush.xpose.msk.msrb.mxu0 %vm285_vm0, %v223_v17  ;;  %v1124_v4 = vpop.f32.mrf.mxu2  ;;  %v1122_v17 = vadd.f32 %v1121_v53, %v3797_v12 }
  0xcf   :  { %2589 = vmatpush.xpose.msk.msrb.mxu1 %vm285_vm0, %v239_v18  ;;  %v1147_v5 = vpop.f32.mrf.mxu3  ;;  %v1125_v10 = vadd.f32 %v1124_v4, %v3747_v57  ;;  %v1145_v18 = vadd.f32 %v1144_v54, %v3797_v12 }
  0xd0   :  { %2607 = vmatpush.xpose.msk.msrb.mxu2 %vm285_vm0, %v255_v19  ;;  %v1148_v11 = vadd.f32 %v1147_v5, %v3747_v57  ;;  %v243_v19 = vld [vmem:[%s4105_s0 + $0x700] sm:$0xff] }
  0xd1   :  { %2625 = vmatpush.xpose.msk.msrb.mxu3 %vm285_vm0, %v271_v20  ;;  %v259_v20 = vld [vmem:[%s4105_s0 + $0x780] sm:$0xff] }
  0xd2   :  { %2572 = vmatpush.xpose.msk.msrb.mxu0 %vm285_vm0, %v222_v21  ;;  %v1444_v21 = vmax.f32 %v1125_v10, 0.0 }
  0xd3   :  { %2590 = vmatpush.xpose.msk.msrb.mxu1 %vm285_vm0, %v238_v23  ;;  %v1445_v23 = vmax.f32 %v1148_v11, 0.0 }
  0xd4   :  { %2608 = vmatpush.xpose.msk.msrb.mxu2 %vm285_vm0, %v254_v24  ;;  %v1079_v24 = vadd.f32 %v1078_v13, %v3747_v57 }
  0xd5   :  { %2626 = vmatpush.xpose.msk.msrb.mxu3 %vm285_vm0, %v270_v25  ;;  %v1102_v25 = vadd.f32 %v1101_v14, %v3747_v57 }
  0xd6   :  { %2573 = vmatpush.xpose.msk.msrb.mxu0 %vm285_vm0, %v221_v26  ;;  %v1076_v26 = vadd.f32 %v1075_v60, %v3797_v12 }
  0xd7   :  { %2591 = vmatpush.xpose.msk.msrb.mxu1 %vm285_vm0, %v237_v27  ;;  %v1099_v27 = vadd.f32 %v1098_v61, %v3797_v12 }
  0xd8   :  { %2609 = vmatpush.xpose.msk.msrb.mxu2 %vm285_vm0, %v253_v28  ;;  %v1428_v28 = vmax.f32 %v1122_v17, 0.0 }
  0xd9   :  { %2627 = vmatpush.xpose.msk.msrb.mxu3 %vm285_vm0, %v269_v29  ;;  %v1429_v29 = vmax.f32 %v1145_v18, 0.0 }
  0xda   :  { %2574 = vmatpush.xpose.msk.msrb.mxu0 %vm285_vm0, %v220_v30  ;;  %v1442_v30 = vmax.f32 %v1079_v24, 0.0 }
  0xdb   :  { %2592 = vmatpush.xpose.msk.msrb.mxu1 %vm285_vm0, %v236_v32  ;;  %v1443_v32 = vmax.f32 %v1102_v25, 0.0 }
  0xdc   :  { %2610 = vmatpush.xpose.msk.msrb.mxu2 %vm285_vm0, %v252_v33  ;;  %v1426_v33 = vmax.f32 %v1076_v26, 0.0 }
  0xdd   :  { %2628 = vmatpush.xpose.msk.msrb.mxu3 %vm285_vm0, %v268_v34  ;;  %v1427_v34 = vmax.f32 %v1099_v27, 0.0 }
  0xde   :  { %2575 = vmatpush.xpose.msk.msrb.mxu0 %vm285_vm0, %v219_v35 }
  0xdf   :  { %2593 = vmatpush.xpose.msk.msrb.mxu1 %vm285_vm0, %v235_v36 }
  0xe0   :  { %2611 = vmatpush.xpose.msk.msrb.mxu2 %vm285_vm0, %v251_v37 }
  0xe1   :  { %2629 = vmatpush.xpose.msk.msrb.mxu3 %vm285_vm0, %v267_v38 }
  0xe2   :  { %2576 = vmatpush.xpose.msk.msrb.mxu0 %vm285_vm0, %v218_v39 }
  0xe3   :  { %2594 = vmatpush.xpose.msk.msrb.mxu1 %vm285_vm0, %v234_v40 }
  0xe4   :  { %2612 = vmatpush.xpose.msk.msrb.mxu2 %vm285_vm0, %v250_v41 }
  0xe5   :  { %2630 = vmatpush.xpose.msk.msrb.mxu3 %vm285_vm0, %v266_v42 }
  0xe6   :  { %2577 = vmatpush.xpose.msk.msrb.mxu0 %vm285_vm0, %v217_v43 }
  0xe7   :  { %2595 = vmatpush.xpose.msk.msrb.mxu1 %vm285_vm0, %v233_v44 }
  0xe8   :  { %2613 = vmatpush.xpose.msk.msrb.mxu2 %vm285_vm0, %v249_v45 }
  0xe9   :  { %2631 = vmatpush.xpose.msk.msrb.mxu3 %vm285_vm0, %v265_v46 }
  0xea   :  { %2578 = vmatpush.xpose.msk.msrb.mxu0 %vm285_vm0, %v216_v47 }
  0xeb   :  { %2596 = vmatpush.xpose.msk.msrb.mxu1 %vm285_vm0, %v232_v48 }
  0xec   :  { %2614 = vmatpush.xpose.msk.msrb.mxu2 %vm285_vm0, %v248_v49 }
  0xed   :  { %2632 = vmatpush.xpose.msk.msrb.mxu3 %vm285_vm0, %v264_v50 }
  0xee   :  { %2579 = vmatpush.xpose.msk.msrb.mxu0 %vm285_vm0, %v215_v51 }
  0xef   :  { %2597 = vmatpush.xpose.msk.msrb.mxu1 %vm285_vm0, %v231_v52 }
  0xf0   :  { %2615 = vmatpush.xpose.msk.msrb.mxu2 %vm285_vm0, %v247_v55 }
  0xf1   :  { %2633 = vmatpush.xpose.msk.msrb.mxu3 %vm285_vm0, %v263_v56 }
  0xf2   :  { %2580 = vmatpush.xpose.msk.msrb.mxu0 %vm285_vm0, %v214_v58  ;;  %v3852_v58 = vld [vmem:[%s4106_s2 + $0x10] sm:$0xff] }
  0xf3   :  { %2598 = vmatpush.xpose.msk.msrb.mxu1 %vm285_vm0, %v230_v59  ;;  %v3865_v59 = vld [vmem:[%s4106_s2 + $0x18] sm:$0xff] }
  0xf4   :  { %2616 = vmatpush.xpose.msk.msrb.mxu2 %vm285_vm0, %v246_v62  ;;  %1465 = vperm.xlu1 %2694, %v3865_v59  }
  0xf5   :  { %2634 = vmatpush.xpose.msk.msrb.mxu3 %vm285_vm0, %v262_v63 }
  0xf6   :  { %2581 = vmatpush.xpose.msk.msrb.mxu0 %vm285_vm0, %v213_v0 }
  0xf7   :  { %2599 = vmatpush.xpose.msk.msrb.mxu1 %vm285_vm0, %v229_v1 }
  0xf8   :  { %2617 = vmatpush.xpose.msk.msrb.mxu2 %vm285_vm0, %v245_v2 }
  0xf9   :  { %2635 = vmatpush.xpose.msk.msrb.mxu3 %vm285_vm0, %v261_v3 }
  0xfa   :  { %2582 = vmatpush.xpose.msk.msrb.mxu0 %vm285_vm0, %v212_v6 }
  0xfb   :  { %2600 = vmatpush.xpose.msk.msrb.mxu1 %vm285_vm0, %v228_v7 }
  0xfc   :  { %2618 = vmatpush.xpose.msk.msrb.mxu2 %vm285_vm0, %v244_v8  ;;  %1460 = vperm.xlu1 %2694, %v3852_v58  }
  0xfd   :  { %2636 = vmatpush.xpose.msk.msrb.mxu3 %vm285_vm0, %v260_v9 }
  0xfe   :  { %2583 = vmatpush.xpose.msk.msrb.mxu0 %vm285_vm0, %v211_v15  ;;  %v1167_v35 = vpop.f32.mrf.mxu0 }
  0xff   :  { %2601 = vmatpush.xpose.msk.msrb.mxu1 %vm285_vm0, %v227_v16  ;;  %v1190_v36 = vpop.f32.mrf.mxu1 }
 0x100   :  { %2619 = vmatpush.xpose.msk.msrb.mxu2 %vm285_vm0, %v243_v19  ;;  %v1191_v39 = vadd.f32 %v1190_v36, %v3797_v12 }
 0x101   :  { %2637 = vmatpush.xpose.msk.msrb.mxu3 %vm285_vm0, %v259_v20  ;;  %2584 = vmatmul.msk.f32.vlgmr.msrb.gmra.mxu0 %vm285_vm0, %v3074_v22 }
 0x102   :  { %2602 = vmatmul.msk.f32.vlgmr.msrb.gmra.mxu1 %vm285_vm0, %v3074_v22  ;;  %1487 = vmatpush.msra.mxu0 %v1442_v30  ;;  %v1431_v45 = vmax.f32 %v1191_v39, 0.0 }
 0x103   :  { %2620 = vmatmul.msk.f32.vlgmr.msrb.gmra.mxu2 %vm285_vm0, %v3074_v22  ;;  %1510 = vmatpush.msra.mxu1 %v1443_v32 }
 0x104   :  { %1533 = vmatpush.msra.mxu2 %v1444_v21  ;;  %2638 = vmatmul.msk.f32.vlgmr.msrb.gmra.mxu3 %vm285_vm0, %v3074_v22  ;;  %v1168_v22 = vadd.f32 %v1167_v35, %v3797_v12 }
 0x105   :  { %1556 = vmatpush.msra.mxu3 %v1445_v23  ;;  %1488 = vmatpush.msra.mxu0 %v1426_v33 }
 0x106   :  { %1534 = vmatpush.msra.mxu2 %v1428_v28  ;;  %1511 = vmatpush.msra.mxu1 %v1427_v34  ;;  %v1213_v37 = vpop.f32.mrf.mxu2  ;;  %v1170_v40 = vpop.f32.mrf.mxu0  ;;  %v1430_v44 = vmax.f32 %v1168_v22, 0.0 }
 0x107   :  { %1557 = vmatpush.msra.mxu3 %v1429_v29  ;;  %v1236_v38 = vpop.f32.mrf.mxu3  ;;  %v1193_v41 = vpop.f32.mrf.mxu1  ;;  %v1171_v42 = vadd.f32 %v1170_v40, %v3747_v57  ;;  %v1214_v48 = vadd.f32 %v1213_v37, %v3797_v12 }
 0x108   :  { %v1194_v43 = vadd.f32 %v1193_v41, %v3747_v57  ;;  %v1237_v49 = vadd.f32 %v1236_v38, %v3797_v12 }
 0x109   :  { %2585 = vmatmul.msk.f32.gmra.mxu0 %vm285_vm0, %v3119_v31  ;;  %v1446_v46 = vmax.f32 %v1171_v42, 0.0  ;;  %v1432_v53 = vmax.f32 %v1214_v48, 0.0 }
 0x10a   :  { %2603 = vmatmul.msk.f32.gmra.mxu1 %vm285_vm0, %v3119_v31  ;;  %v1447_v47 = vmax.f32 %v1194_v43, 0.0  ;;  %v1433_v54 = vmax.f32 %v1237_v49, 0.0 }
 0x10b   :  { %2621 = vmatmul.msk.f32.gmra.mxu2 %vm285_vm0, %v3119_v31  ;;  %1579 = vmatpush.msrb.mxu0 %v1446_v46 }
 0x10c   :  { %2639 = vmatmul.msk.f32.gmra.mxu3 %vm285_vm0, %v3119_v31  ;;  %1602 = vmatpush.msrb.mxu1 %v1447_v47 }
 0x10d   :  { %1580 = vmatpush.msrb.mxu0 %v1430_v44 }
 0x10e   :  { %v1216_v50 = vpop.f32.mrf.mxu2  ;;  %1603 = vmatpush.msrb.mxu1 %v1431_v45 }
 0x10f   :  { %v1239_v31 = vpop.f32.mrf.mxu3  ;;  %v1217_v51 = vadd.f32 %v1216_v50, %v3747_v57 }
 0x110   :  { %v1240_v52 = vadd.f32 %v1239_v31, %v3747_v57 }
 0x111   :  { %v1448_v55 = vmax.f32 %v1217_v51, 0.0  ;;  %2640 = vmatmul.msk.f32.vlgmr.msra.gmra.mxu0 %vm1468_vm1, %v3852_v58 }
 0x112   :  { %v1449_v56 = vmax.f32 %v1240_v52, 0.0  ;;  %2642 = vmatmul.msk.f32.vlgmr.msra.gmra.mxu1 %vm1468_vm1, %v3852_v58 }
 0x113   :  { %1625 = vmatpush.msrb.mxu2 %v1448_v55 }
 0x114   :  { %1648 = vmatpush.msrb.mxu3 %v1449_v56  ;;  %2644 = vmatmul.msk.f32.vlgmr.msra.gmra.mxu2 %vm1468_vm1, %v3852_v58 }
 0x115   :  { %1626 = vmatpush.msrb.mxu2 %v1432_v53  ;;  %2646 = vmatmul.msk.f32.vlgmr.msra.gmra.mxu3 %vm1468_vm1, %v3852_v58 }
 0x116   :  { %1649 = vmatpush.msrb.mxu3 %v1433_v54 }
 0x119   :  { %2641 = vmatmul.msk.f32.gmra.mxu0 %vm1468_vm1, %v3865_v59 }
 0x11a   :  { %2643 = vmatmul.msk.f32.gmra.mxu1 %vm1468_vm1, %v3865_v59 }
 0x11c   :  { %2645 = vmatmul.msk.f32.gmra.mxu2 %vm1468_vm1, %v3865_v59 }
 0x11d   :  { %2647 = vmatmul.msk.f32.gmra.mxu3 %vm1468_vm1, %v3865_v59 }
 0x121   :  { %2648 = vmatmul.msk.f32.vlgmr.msrb.gmra.mxu0 %vm1468_vm1, %v3852_v58 }
 0x122   :  { %2650 = vmatmul.msk.f32.vlgmr.msrb.gmra.mxu1 %vm1468_vm1, %v3852_v58 }
 0x124   :  { %2652 = vmatmul.msk.f32.vlgmr.msrb.gmra.mxu2 %vm1468_vm1, %v3852_v58 }
 0x125   :  { %2654 = vmatmul.msk.f32.vlgmr.msrb.gmra.mxu3 %vm1468_vm1, %v3852_v58 }
 0x129   :  { %2649 = vmatmul.msk.f32.gmra.mxu0 %vm1468_vm1, %v3865_v59 }
 0x12a   :  { %2651 = vmatmul.msk.f32.gmra.mxu1 %vm1468_vm1, %v3865_v59 }
 0x12c   :  { %2653 = vmatmul.msk.f32.gmra.mxu2 %vm1468_vm1, %v3865_v59 }
 0x12d   :  { %2655 = vmatmul.msk.f32.gmra.mxu3 %vm1468_vm1, %v3865_v59 }
 0x13e   :  { %v1259_v60 = vpop.f32.mrf.mxu0 }
 0x13f   :  { %v1282_v61 = vpop.f32.mrf.mxu1  ;;  %v1260_v0 = vadd.f32 %v1259_v60, %v3797_v12 }
 0x140   :  { %v1283_v1 = vadd.f32 %v1282_v61, %v3797_v12 }
 0x141   :  { %v1434_v6 = vmax.f32 %v1260_v0, 0.0 }
 0x142   :  { %v1435_v7 = vmax.f32 %v1283_v1, 0.0 }
 0x146   :  { %v1305_v62 = vpop.f32.mrf.mxu2  ;;  %v1262_v2 = vpop.f32.mrf.mxu0 }
 0x147   :  { %v1328_v63 = vpop.f32.mrf.mxu3  ;;  %v1285_v3 = vpop.f32.mrf.mxu1  ;;  %v1263_v4 = vadd.f32 %v1262_v2, %v3747_v57  ;;  %v1306_v10 = vadd.f32 %v1305_v62, %v3797_v12 }
 0x148   :  { %v1286_v5 = vadd.f32 %v1285_v3, %v3747_v57  ;;  %v1329_v11 = vadd.f32 %v1328_v63, %v3797_v12 }
 0x149   :  { %v1450_v8 = vmax.f32 %v1263_v4, 0.0  ;;  %v1436_v17 = vmax.f32 %v1306_v10, 0.0 }
 0x14a   :  { %v1451_v9 = vmax.f32 %v1286_v5, 0.0  ;;  %v1437_v18 = vmax.f32 %v1329_v11, 0.0 }
 0x14b   :  { %1671 = vmatpush.msra.mxu0 %v1450_v8  ;;  %v3956_v8 = vld [vmem:[%s4106_s2 + $0x20] sm:$0x3] }
 0x14c   :  { %1694 = vmatpush.msra.mxu1 %v1451_v9  ;;  %1875 = vperm.xlu2 %2695, %v3956_v8  }
 0x14d   :  { %1672 = vmatpush.msra.mxu0 %v1434_v6 }
 0x14e   :  { %v1308_v13 = vpop.f32.mrf.mxu2  ;;  %1695 = vmatpush.msra.mxu1 %v1435_v7  ;;  %2656 = vmatmul.msk.f32.vlgmr.msra.gmra.mxu0 %vm1468_vm1, %v3852_v58 }
 0x14f   :  { %v1331_v14 = vpop.f32.mrf.mxu3  ;;  %v1309_v15 = vadd.f32 %v1308_v13, %v3747_v57  ;;  %2658 = vmatmul.msk.f32.vlgmr.msra.gmra.mxu1 %vm1468_vm1, %v3852_v58 }
 0x150   :  { %v1332_v16 = vadd.f32 %v1331_v14, %v3747_v57 }
 0x151   :  { %v1452_v19 = vmax.f32 %v1309_v15, 0.0 }
 0x152   :  { %v1453_v20 = vmax.f32 %v1332_v16, 0.0 }
 0x153   :  { %1717 = vmatpush.msra.mxu2 %v1452_v19 }
 0x154   :  { %1740 = vmatpush.msra.mxu3 %v1453_v20 }
 0x155   :  { %1718 = vmatpush.msra.mxu2 %v1436_v17 }
 0x156   :  { %1741 = vmatpush.msra.mxu3 %v1437_v18  ;;  %2660 = vmatmul.msk.f32.vlgmr.msra.gmra.mxu2 %vm1468_vm1, %v3852_v58 }
 0x157   :  { %2662 = vmatmul.msk.f32.vlgmr.msra.gmra.mxu3 %vm1468_vm1, %v3852_v58  ;;  %2657 = vmatmul.msk.f32.gmra.mxu0 %vm1468_vm1, %v3865_v59 }
 0x158   :  { %2659 = vmatmul.msk.f32.gmra.mxu1 %vm1468_vm1, %v3865_v59 }
 0x15e   :  { %2661 = vmatmul.msk.f32.gmra.mxu2 %vm1468_vm1, %v3865_v59 }
 0x15f   :  { %2663 = vmatmul.msk.f32.gmra.mxu3 %vm1468_vm1, %v3865_v59 }
 0x17e   :  { %v1351_v21 = vpop.f32.mrf.mxu0 }
 0x17f   :  { %v1374_v23 = vpop.f32.mrf.mxu1  ;;  %v1352_v28 = vadd.f32 %v1351_v21, %v3797_v12 }
 0x180   :  { %v1375_v29 = vadd.f32 %v1374_v23, %v3797_v12 }
 0x181   :  { %v1438_v35 = vmax.f32 %v1352_v28, 0.0 }
 0x182   :  { %v1439_v36 = vmax.f32 %v1375_v29, 0.0 }
 0x186   :  { %v1397_v24 = vpop.f32.mrf.mxu2  ;;  %v1354_v26 = vpop.f32.mrf.mxu0 }
 0x187   :  { %v1420_v25 = vpop.f32.mrf.mxu3  ;;  %v1377_v27 = vpop.f32.mrf.mxu1  ;;  %v1355_v30 = vadd.f32 %v1354_v26, %v3747_v57  ;;  %v1398_v37 = vadd.f32 %v1397_v24, %v3797_v12 }
 0x188   :  { %v1378_v32 = vadd.f32 %v1377_v27, %v3747_v57  ;;  %v1421_v39 = vadd.f32 %v1420_v25, %v3797_v12 }
 0x189   :  { %v1454_v33 = vmax.f32 %v1355_v30, 0.0  ;;  %v1440_v44 = vmax.f32 %v1398_v37, 0.0 }
 0x18a   :  { %v1455_v34 = vmax.f32 %v1378_v32, 0.0  ;;  %v1441_v45 = vmax.f32 %v1421_v39, 0.0 }
 0x18b   :  { %1763 = vmatpush.msrb.mxu0 %v1454_v33 }
 0x18c   :  { %1786 = vmatpush.msrb.mxu1 %v1455_v34 }
 0x18d   :  { %1764 = vmatpush.msrb.mxu0 %v1438_v35 }
 0x18e   :  { %v1400_v38 = vpop.f32.mrf.mxu2  ;;  %1787 = vmatpush.msrb.mxu1 %v1439_v36  ;;  %2664 = vmatmul.msk.f32.vlgmr.msrb.gmra.mxu0 %vm1468_vm1, %v3852_v58  ;;  %v1490_v12 = vpop.f32.mrf.mxu0 }
 0x18f   :  { %v1423_v22 = vpop.f32.mrf.mxu3  ;;  %v1401_v40 = vadd.f32 %v1400_v38, %v3747_v57  ;;  %2666 = vmatmul.msk.f32.vlgmr.msrb.gmra.mxu1 %vm1468_vm1, %v3852_v58  ;;  %v1513_v46 = vpop.f32.mrf.mxu1 }
 0x190   :  { %v1424_v41 = vadd.f32 %v1423_v22, %v3747_v57  ;;  %v3941_v57 = vpop.permute.xlu1 %1465 }
 0x191   :  { %v1456_v42 = vmax.f32 %v1401_v40, 0.0 }
 0x192   :  { %v1457_v43 = vmax.f32 %v1424_v41, 0.0 }
 0x193   :  { %1809 = vmatpush.msrb.mxu2 %v1456_v42 }
 0x194   :  { %1832 = vmatpush.msrb.mxu3 %v1457_v43 }
 0x195   :  { %1810 = vmatpush.msrb.mxu2 %v1440_v44 }
 0x196   :  { %1833 = vmatpush.msrb.mxu3 %v1441_v45  ;;  %2668 = vmatmul.msk.f32.vlgmr.msrb.gmra.mxu2 %vm1468_vm1, %v3852_v58  ;;  %v1493_v51 = vpop.f32.mrf.mxu0 }
 0x197   :  { %2670 = vmatmul.msk.f32.vlgmr.msrb.gmra.mxu3 %vm1468_vm1, %v3852_v58  ;;  %2665 = vmatmul.msk.f32.gmra.mxu0 %vm1468_vm1, %v3865_v59  ;;  %v1536_v47 = vpop.f32.mrf.mxu2  ;;  %v1516_v52 = vpop.f32.mrf.mxu1  ;;  %v1494_v53 = vadd.f32 %v1493_v51, %v3941_v57 }
 0x198   :  { %2667 = vmatmul.msk.f32.gmra.mxu1 %vm1468_vm1, %v3865_v59  ;;  %v1559_v48 = vpop.f32.mrf.mxu3  ;;  %v3943_v49 = vpop.permute.xlu1 %1460  ;;  %v1517_v54 = vadd.f32 %v1516_v52, %v3941_v57 }
 0x199   :  { %v1491_v50 = vadd.f32 %v1490_v12, %v3943_v49  ;;  %v1514_v31 = vadd.f32 %v1513_v46, %v3943_v49  ;;  %v1857_v55 = vmax.f32 %v1494_v53, 0.0  ;;  %v1537_v60 = vadd.f32 %v1536_v47, %v3943_v49 }
 0x19a   :  { %v1858_v56 = vmax.f32 %v1517_v54, 0.0  ;;  %v1560_v61 = vadd.f32 %v1559_v48, %v3943_v49 }
 0x19b   :  { %v1841_v58 = vmax.f32 %v1491_v50, 0.0  ;;  %1894 = vmatpush.msra.mxu0 %v1857_v55  ;;  %v1843_v6 = vmax.f32 %v1537_v60, 0.0 }
 0x19c   :  { %1914 = vmatpush.msra.mxu1 %v1858_v56  ;;  %v1844_v7 = vmax.f32 %v1560_v61, 0.0 }
 0x19d   :  { %1895 = vmatpush.msra.mxu0 %v1841_v58 }
 0x19e   :  { %2669 = vmatmul.msk.f32.gmra.mxu2 %vm1468_vm1, %v3865_v59  ;;  %v1582_v2 = vpop.f32.mrf.mxu0 }
 0x19f   :  { %2671 = vmatmul.msk.f32.gmra.mxu3 %vm1468_vm1, %v3865_v59  ;;  %v1842_v59 = vmax.f32 %v1514_v31, 0.0  ;;  %v1539_v62 = vpop.f32.mrf.mxu2  ;;  %v1605_v3 = vpop.f32.mrf.mxu1  ;;  %2672 = vmatmul.msk.f32.vlgmr.msra.gmra.mxu0 %vm1468_vm1, %v3956_v8  ;;  %v1583_v11 = vadd.f32 %v1582_v2, %v3943_v49 }
 0x1a0   :  { %v1562_v63 = vpop.f32.mrf.mxu3  ;;  %v1540_v0 = vadd.f32 %v1539_v62, %v3941_v57  ;;  %v1606_v13 = vadd.f32 %v1605_v3, %v3943_v49 }
 0x1a1   :  { %v1563_v1 = vadd.f32 %v1562_v63, %v3941_v57  ;;  %1915 = vmatpush.msra.mxu1 %v1842_v59  ;;  %v1845_v20 = vmax.f32 %v1583_v11, 0.0 }
 0x1a2   :  { %v1859_v4 = vmax.f32 %v1540_v0, 0.0  ;;  %2673 = vmatmul.msk.f32.vlgmr.msra.gmra.mxu1 %vm1468_vm1, %v3956_v8  ;;  %v1846_v21 = vmax.f32 %v1606_v13, 0.0 }
 0x1a3   :  { %v1860_v5 = vmax.f32 %v1563_v1, 0.0 }
 0x1a4   :  { %1934 = vmatpush.msra.mxu2 %v1859_v4 }
 0x1a5   :  { %1954 = vmatpush.msra.mxu3 %v1860_v5 }
 0x1a6   :  { %1935 = vmatpush.msra.mxu2 %v1843_v6  ;;  %v1585_v14 = vpop.f32.mrf.mxu0 }
 0x1a7   :  { %1955 = vmatpush.msra.mxu3 %v1844_v7  ;;  %v1628_v9 = vpop.f32.mrf.mxu2  ;;  %2674 = vmatmul.msk.f32.vlgmr.msra.gmra.mxu2 %vm1468_vm1, %v3956_v8  ;;  %v1608_v15 = vpop.f32.mrf.mxu1  ;;  %v1586_v16 = vadd.f32 %v1585_v14, %v3941_v57 }
 0x1a8   :  { %v1651_v10 = vpop.f32.mrf.mxu3  ;;  %2675 = vmatmul.msk.f32.vlgmr.msra.gmra.mxu3 %vm1468_vm1, %v3956_v8  ;;  %v1609_v17 = vadd.f32 %v1608_v15, %v3941_v57  ;;  %v1629_v23 = vadd.f32 %v1628_v9, %v3943_v49 }
 0x1a9   :  { %v1861_v18 = vmax.f32 %v1586_v16, 0.0  ;;  %v1652_v24 = vadd.f32 %v1651_v10, %v3943_v49 }
 0x1aa   :  { %v1862_v19 = vmax.f32 %v1609_v17, 0.0  ;;  %v1847_v32 = vmax.f32 %v1629_v23, 0.0 }
 0x1ab   :  { %1974 = vmatpush.msrb.mxu0 %v1861_v18  ;;  %v1848_v33 = vmax.f32 %v1652_v24, 0.0  ;;  %v1876_v24 = vpop.permute.xlu2 %1875 }
 0x1ac   :  { %1994 = vmatpush.msrb.mxu1 %v1862_v19 }
 0x1ad   :  { %1975 = vmatpush.msrb.mxu0 %v1845_v20 }
 0x1ae   :  { %1995 = vmatpush.msrb.mxu1 %v1846_v21  ;;  %2676 = vmatmul.msk.f32.vlgmr.msrb.gmra.mxu0 %vm1468_vm1, %v3956_v8 }
 0x1af   :  { %v1631_v25 = vpop.f32.mrf.mxu2  ;;  %2677 = vmatmul.msk.f32.vlgmr.msrb.gmra.mxu1 %vm1468_vm1, %v3956_v8 }
 0x1b0   :  { %v1654_v26 = vpop.f32.mrf.mxu3  ;;  %v1632_v27 = vadd.f32 %v1631_v25, %v3941_v57 }
 0x1b1   :  { %v1655_v28 = vadd.f32 %v1654_v26, %v3941_v57 }
 0x1b2   :  { %v1863_v29 = vmax.f32 %v1632_v27, 0.0 }
 0x1b3   :  { %v1864_v30 = vmax.f32 %v1655_v28, 0.0 }
 0x1b4   :  { %2014 = vmatpush.msrb.mxu2 %v1863_v29 }
 0x1b5   :  { %2034 = vmatpush.msrb.mxu3 %v1864_v30 }
 0x1b6   :  { %2015 = vmatpush.msrb.mxu2 %v1847_v32 }
 0x1b7   :  { %2035 = vmatpush.msrb.mxu3 %v1848_v33  ;;  %2678 = vmatmul.msk.f32.vlgmr.msrb.gmra.mxu2 %vm1468_vm1, %v3956_v8 }
 0x1b8   :  { %2679 = vmatmul.msk.f32.vlgmr.msrb.gmra.mxu3 %vm1468_vm1, %v3956_v8 }
 0x1cb   :  { %v1674_v34 = vpop.f32.mrf.mxu0 }
 0x1cc   :  { %v1697_v35 = vpop.f32.mrf.mxu1  ;;  %v1675_v36 = vadd.f32 %v1674_v34, %v3943_v49 }
 0x1cd   :  { %v1698_v37 = vadd.f32 %v1697_v35, %v3943_v49 }
 0x1ce   :  { %v1849_v43 = vmax.f32 %v1675_v36, 0.0 }
 0x1cf   :  { %v1850_v44 = vmax.f32 %v1698_v37, 0.0 }
 0x1d4   :  { %v1677_v39 = vpop.f32.mrf.mxu0 }
 0x1d5   :  { %v1700_v40 = vpop.f32.mrf.mxu1  ;;  %v1678_v41 = vadd.f32 %v1677_v39, %v3941_v57 }
 0x1d6   :  { %v1701_v42 = vadd.f32 %v1700_v40, %v3941_v57 }
 0x1d7   :  { %v1865_v45 = vmax.f32 %v1678_v41, 0.0 }
 0x1d8   :  { %v1866_v12 = vmax.f32 %v1701_v42, 0.0 }
 0x1d9   :  { %v1720_v38 = vpop.f32.mrf.mxu2  ;;  %2054 = vmatpush.msra.mxu0 %v1865_v45 }
 0x1da   :  { %v1743_v22 = vpop.f32.mrf.mxu3  ;;  %2074 = vmatpush.msra.mxu1 %v1866_v12  ;;  %v1721_v46 = vadd.f32 %v1720_v38, %v3943_v49 }
 0x1db   :  { %v1744_v47 = vadd.f32 %v1743_v22, %v3943_v49  ;;  %2055 = vmatpush.msra.mxu0 %v1849_v43 }
 0x1dc   :  { %2075 = vmatpush.msra.mxu1 %v1850_v44  ;;  %2680 = vmatmul.msk.f32.vlgmr.msra.gmra.mxu0 %vm1468_vm1, %v3956_v8  ;;  %v1851_v52 = vmax.f32 %v1721_v46, 0.0 }
 0x1dd   :  { %2681 = vmatmul.msk.f32.vlgmr.msra.gmra.mxu1 %vm1468_vm1, %v3956_v8  ;;  %v1852_v53 = vmax.f32 %v1744_v47, 0.0 }
 0x1e1   :  { %v1723_v48 = vpop.f32.mrf.mxu2 }
 0x1e2   :  { %v1746_v50 = vpop.f32.mrf.mxu3  ;;  %v1724_v31 = vadd.f32 %v1723_v48, %v3941_v57 }
 0x1e3   :  { %v1747_v51 = vadd.f32 %v1746_v50, %v3941_v57 }
 0x1e4   :  { %v1867_v54 = vmax.f32 %v1724_v31, 0.0 }
 0x1e5   :  { %v1868_v55 = vmax.f32 %v1747_v51, 0.0 }
 0x1e6   :  { %2094 = vmatpush.msra.mxu2 %v1867_v54 }
 0x1e7   :  { %2114 = vmatpush.msra.mxu3 %v1868_v55 }
 0x1e8   :  { %2095 = vmatpush.msra.mxu2 %v1851_v52 }
 0x1e9   :  { %2115 = vmatpush.msra.mxu3 %v1852_v53  ;;  %2682 = vmatmul.msk.f32.vlgmr.msra.gmra.mxu2 %vm1468_vm1, %v3956_v8 }
 0x1ea   :  { %2683 = vmatmul.msk.f32.vlgmr.msra.gmra.mxu3 %vm1468_vm1, %v3956_v8 }
 0x20b   :  { %v1766_v56 = vpop.f32.mrf.mxu0 }
 0x20c   :  { %v1789_v58 = vpop.f32.mrf.mxu1  ;;  %v1767_v61 = vadd.f32 %v1766_v56, %v3943_v49 }
 0x20d   :  { %v1790_v62 = vadd.f32 %v1789_v58, %v3943_v49 }
 0x20e   :  { %v1853_v3 = vmax.f32 %v1767_v61, 0.0 }
 0x20f   :  { %v1854_v4 = vmax.f32 %v1790_v62, 0.0 }
 0x214   :  { %v1769_v59 = vpop.f32.mrf.mxu0 }
 0x215   :  { %v1792_v60 = vpop.f32.mrf.mxu1  ;;  %v1770_v63 = vadd.f32 %v1769_v59, %v3941_v57 }
 0x216   :  { %v1793_v0 = vadd.f32 %v1792_v60, %v3941_v57 }
 0x217   :  { %v1869_v1 = vmax.f32 %v1770_v63, 0.0 }
 0x218   :  { %v1870_v2 = vmax.f32 %v1793_v0, 0.0 }
 0x219   :  { %v1812_v5 = vpop.f32.mrf.mxu2  ;;  %2134 = vmatpush.msrb.mxu0 %v1869_v1 }
 0x21a   :  { %v1835_v6 = vpop.f32.mrf.mxu3  ;;  %2154 = vmatpush.msrb.mxu1 %v1870_v2  ;;  %v1813_v10 = vadd.f32 %v1812_v5, %v3943_v49 }
 0x21b   :  { %2135 = vmatpush.msrb.mxu0 %v1853_v3  ;;  %v1836_v11 = vadd.f32 %v1835_v6, %v3943_v49 }
 0x21c   :  { %2155 = vmatpush.msrb.mxu1 %v1854_v4  ;;  %2684 = vmatmul.msk.f32.vlgmr.msrb.gmra.mxu0 %vm1468_vm1, %v3956_v8  ;;  %v1855_v17 = vmax.f32 %v1813_v10, 0.0  ;;  %v1897_v19 = vpop.f32.mrf.mxu0 }
 0x21d   :  { %2685 = vmatmul.msk.f32.vlgmr.msrb.gmra.mxu1 %vm1468_vm1, %v3956_v8  ;;  %v1856_v18 = vmax.f32 %v1836_v11, 0.0  ;;  %v1898_v29 = vadd.f32 %v1897_v19, %v1876_v24 }
 0x21f   :  { %v1917_v49 = vpop.f32.mrf.mxu1  ;;  %v2265_v34 = vrot.slane %v1898_v29, 1 }
 0x220   :  { %v4015_v30 = vadd.f32 %v1917_v49, %v1876_v24 }
 0x221   :  { %v1815_v7 = vpop.f32.mrf.mxu2 }
 0x222   :  { %v1838_v9 = vpop.f32.mrf.mxu3  ;;  %v1816_v13 = vadd.f32 %v1815_v7, %v3941_v57 }
 0x223   :  { %v1839_v14 = vadd.f32 %v1838_v9, %v3941_v57 }
 0x224   :  { %v1871_v15 = vmax.f32 %v1816_v13, 0.0 }
 0x225   :  { %v1872_v16 = vmax.f32 %v1839_v14, 0.0 }
 0x226   :  { %2174 = vmatpush.msrb.mxu2 %v1871_v15 }
 0x227   :  { %2194 = vmatpush.msrb.mxu3 %v1872_v16 }
 0x228   :  { %2175 = vmatpush.msrb.mxu2 %v1855_v17 }
 0x229   :  { %2195 = vmatpush.msrb.mxu3 %v1856_v18  ;;  %2686 = vmatmul.msk.f32.vlgmr.msrb.gmra.mxu2 %vm1468_vm1, %v3956_v8 }
 0x22a   :  { %2687 = vmatmul.msk.f32.vlgmr.msrb.gmra.mxu3 %vm1468_vm1, %v3956_v8  ;;  %v1937_v20 = vpop.f32.mrf.mxu2  ;;  %v2266_v8 = vrot.slane %v4015_v30, 1 }
 0x22b   :  { %v1957_v21 = vpop.f32.mrf.mxu3  ;;  %v1977_v23 = vpop.f32.mrf.mxu0  ;;  %v1938_v35 = vadd.f32 %v1937_v20, %v1876_v24 }
 0x22c   :  { %v1997_v57 = vpop.f32.mrf.mxu1  ;;  %v4017_v32 = vadd.f32 %v1977_v23, %v1876_v24  ;;  %v1958_v37 = vadd.f32 %v1957_v21, %v1876_v24 }
 0x22d   :  { %v4019_v33 = vadd.f32 %v1997_v57, %v1876_v24  ;;  %v2293_v40 = vsel %vm2242_vm2, %v2265_v34, %v1938_v35  ;;  %v2202_v6 = vrot.slane %v1938_v35, 7 }
 0x22e   :  { %v2269_v22 = vrot.slane %v4017_v32, 7  ;;  %v2294_v41 = vsel %vm2242_vm2, %v2266_v8, %v1958_v37  ;;  %v2203_v7 = vrot.slane %v1958_v37, 7  ;;  %v2208_v16 = vrot.slane %v4017_v32, 6 }
 0x22f   :  { %v2270_v39 = vrot.slane %v4019_v33, 7  ;;  %v2243_v19 = vsel %vm2242_vm2, %v1898_v29, %v2202_v6  ;;  %v2209_v49 = vrot.slane %v4019_v33, 6 }
 0x230   :  { %v2295_v50 = vsel %vm2245_vm3, %v2293_v40, %v2269_v22  ;;  %v2244_v23 = vsel %vm2242_vm2, %v4015_v30, %v2203_v7 }
 0x231   :  { %v2296_v31 = vsel %vm2245_vm3, %v2294_v41, %v2270_v39 }
 0x23a   :  { %v2017_v25 = vpop.f32.mrf.mxu2 }
 0x23b   :  { %v2037_v26 = vpop.f32.mrf.mxu3  ;;  %v4022_v36 = vadd.f32 %v2017_v25, %v1876_v24 }
 0x23c   :  { %v4024_v38 = vadd.f32 %v2037_v26, %v1876_v24  ;;  %v2246_v26 = vsel %vm2245_vm3, %v2243_v19, %v2208_v16 }
 0x23d   :  { %v2273_v12 = vrot.slane %v4022_v36, 6  ;;  %v2214_v57 = vrot.slane %v4022_v36, 5 }
 0x23e   :  { %v2274_v46 = vrot.slane %v4024_v38, 6 }
 0x23f   :  { %v2297_v58 = vsel %vm2248_vm4, %v2295_v50, %v2273_v12  ;;  %v2249_v33 = vsel %vm2248_vm4, %v2246_v26, %v2214_v57 }
 0x240   :  { %v2298_v59 = vsel %vm2248_vm4, %v2296_v31, %v2274_v46 }
 0x259   :  { %v2057_v27 = vpop.f32.mrf.mxu0 }
 0x25a   :  { %v2077_v28 = vpop.f32.mrf.mxu1  ;;  %v4030_v42 = vadd.f32 %v2057_v27, %v1876_v24  ;;  %v2215_v27 = vrot.slane %v4024_v38, 5 }
 0x25b   :  { %v4032_v44 = vadd.f32 %v2077_v28, %v1876_v24  ;;  %v2247_v28 = vsel %vm2245_vm3, %v2244_v23, %v2209_v49 }
 0x25c   :  { %v2277_v53 = vrot.slane %v4030_v42, 5  ;;  %v2220_v29 = vrot.slane %v4030_v42, 4  ;;  %v2250_v30 = vsel %vm2248_vm4, %v2247_v28, %v2215_v27 }
 0x25d   :  { %v2278_v54 = vrot.slane %v4032_v44, 5  ;;  %v2221_v8 = vrot.slane %v4032_v44, 4  ;;  %v2315_v44 = vld [vmem:[%s4107_s1] sm:$0xff] }
 0x25e   :  { %v2299_v62 = vsel %vm2251_vm5, %v2297_v58, %v2277_v53  ;;  %v2252_v36 = vsel %vm2251_vm5, %v2249_v33, %v2220_v29 }
 0x25f   :  { %v2300_v63 = vsel %vm2251_vm5, %v2298_v59, %v2278_v54  ;;  %v2253_v22 = vsel %vm2251_vm5, %v2250_v30, %v2221_v8  ;;  %v2323_v59 = vmul.f32 %v2315_v44, %v2315_v44 }
 0x26c   :  { %v2097_v43 = vpop.f32.mrf.mxu2 }
 0x26d   :  { %v2117_v45 = vpop.f32.mrf.mxu3  ;;  %v4038_v51 = vadd.f32 %v2097_v43, %v1876_v24 }
 0x26e   :  { %v4040_v52 = vadd.f32 %v2117_v45, %v1876_v24 }
 0x26f   :  { %v2281_v60 = vrot.slane %v4038_v51, 4  ;;  %v2226_v35 = vrot.slane %v4038_v51, 3 }
 0x270   :  { %v2282_v61 = vrot.slane %v4040_v52, 4  ;;  %v2227_v37 = vrot.slane %v4040_v52, 3 }
 0x271   :  { %v2301_v9 = vsel %vm2254_vm6, %v2299_v62, %v2281_v60  ;;  %v2255_v43 = vsel %vm2254_vm6, %v2252_v36, %v2226_v35 }
 0x272   :  { %v2302_v10 = vsel %vm2254_vm6, %v2300_v63, %v2282_v61  ;;  %v2256_v12 = vsel %vm2254_vm6, %v2253_v22, %v2227_v37 }
 0x299   :  { %v2137_v47 = vpop.f32.mrf.mxu0 }
 0x29a   :  { %v2157_v48 = vpop.f32.mrf.mxu1  ;;  %v4044_v55 = vadd.f32 %v2137_v47, %v1876_v24 }
 0x29b   :  { %v4046_v56 = vadd.f32 %v2157_v48, %v1876_v24  ;;  %v2316_v48 = vld [vmem:[%s4107_s1 + $0x8] sm:$0xff] }
 0x29c   :  { %v2285_v0 = vrot.slane %v4044_v55, 3  ;;  %v2232_v38 = vrot.slane %v4044_v55, 2  ;;  %v2324_v62 = vmul.f32 %v2316_v48, %v2316_v48 }
 0x29d   :  { %v2286_v1 = vrot.slane %v4046_v56, 3  ;;  %v2233_v39 = vrot.slane %v4046_v56, 2 }
 0x29e   :  { %v2303_v14 = vsel %vm2257_vm7, %v2301_v9, %v2285_v0  ;;  %v2258_v46 = vsel %vm2257_vm7, %v2255_v43, %v2232_v38 }
 0x29f   :  { %v2304_v15 = vsel %vm2257_vm7, %v2302_v10, %v2286_v1  ;;  %v2259_v50 = vsel %vm2257_vm7, %v2256_v12, %v2233_v39  ;;  %v2325_v1 = vmul.f32 -0.5, %v2323_v59 }
 0x2ac   :  { %v2177_v2 = vpop.f32.mrf.mxu2 }
 0x2ad   :  { %v2197_v3 = vpop.f32.mrf.mxu3  ;;  %v2178_v4 = vadd.f32 %v2177_v2, %v1876_v24 }
 0x2ae   :  { %v2198_v5 = vadd.f32 %v2197_v3, %v1876_v24  ;;  %v2326_v3 = vmul.f32 -0.5, %v2324_v62 }
 0x2af   :  { %v2289_v11 = vrot.slane %v2178_v4, 2  ;;  %v2238_v40 = vrot.slane %v2178_v4, 1 }
 0x2b0   :  { %v2290_v13 = vrot.slane %v2198_v5, 2  ;;  %v2239_v41 = vrot.slane %v2198_v5, 1 }
 0x2b1   :  { %v2305_v17 = vsel %vm2260_vm8, %v2303_v14, %v2289_v11  ;;  %v2261_v31 = vsel %vm2260_vm8, %v2258_v46, %v2238_v40 }
 0x2b2   :  { %v2306_v18 = vsel %vm2260_vm8, %v2304_v15, %v2290_v13  ;;  %v2307_v20 = vmax.f32 %v2305_v17, -6.9077554  ;;  %v2262_v53 = vsel %vm2260_vm8, %v2259_v50, %v2239_v41 }
 0x2b3   :  { %v2308_v21 = vmax.f32 %v2306_v18, -6.9077554 }
 0x2b4   :  { %v2309_v24 = vmin.f32 %v2307_v20, 0.0 }
 0x2b5   :  { %v2310_v25 = vmin.f32 %v2308_v21, 0.0 }
 0x2b6   :  { %v2311_v32 = vmul.f32 1.442695, %v2309_v24  ;;  %v2327_v4 = vsub.f32 %v2325_v1, %v2309_v24 }
 0x2b7   :  { %v2313_v34 = vmul.f32 1.442695, %v2310_v25  ;;  %v2328_v5 = vsub.f32 %v2326_v3, %v2310_v25 }
 0x2b8   :  { %2696 = vpow2.f32 %v2311_v32  ;;  %v2688_v9 = vadd.f32 -0.9189385, %v2327_v4 }
 0x2b9   :  { %2698 = vpow2.f32 %v2313_v34  ;;  %v2689_v11 = vadd.f32 -0.9189385, %v2328_v5 }
 0x2be   :  { %v2697_v42 = vpop.eup %2696 }
 0x2bf   :  { %v2699_v45 = vpop.eup %2698  ;;  %v2317_v47 = vmul.f32 %v2697_v42, %v2315_v44 }
 0x2c0   :  { %v2318_v51 = vmul.f32 %v2699_v45, %v2316_v48 }
 0x2c1   :  { %v2319_v52 = vadd.f32 %v2317_v47, %v2261_v31 }
 0x2c2   :  { %v2320_v54 = vadd.f32 %v2318_v51, %v2262_v53 }
 0x2c3   :  { %2700 = vtanh.f32 %v2319_v52 }
 0x2c4   :  { %2702 = vtanh.f32 %v2320_v54 }
 0x2c9   :  { %v2701_v55 = vpop.eup %2700 }
 0x2ca   :  { %v2703_v56 = vpop.eup %2702  ;;  %v2331_v58 = vmul.f32 %v2701_v55, %v2701_v55  ;;  %2343 = vst [vmem:[%s4108_s3] sm:$0xff] %v2701_v55 }
 0x2cb   :  { %v2332_v60 = vmul.f32 %v2703_v56, %v2703_v56  ;;  %2344 = vst [vmem:[%s4108_s3 + $0x8] sm:$0xff] %v2703_v56 }
 0x2cc   :  { %v2333_v61 = vsub.f32 1.0, %v2331_v58 }
 0x2cd   :  { %v2334_v63 = vsub.f32 1.0, %v2332_v60 }
 0x2ce   :  { %v2335_v0 = vadd.f32 1e-06, %v2333_v61 }
 0x2cf   :  { %v2336_v2 = vadd.f32 1e-06, %v2334_v63 }
 0x2d0   :  { %2704 = vlog2.f32 %v2335_v0 }
 0x2d1   :  { %2706 = vlog2.f32 %v2336_v2 }
 0x2d6   :  { %v2705_v6 = vpop.eup %2704 }
 0x2d7   :  { %v2707_v7 = vpop.eup %2706  ;;  %v2338_v10 = vmul.f32 0.6931472, %v2705_v6 }
 0x2d8   :  { %v2340_v13 = vmul.f32 0.6931472, %v2707_v7 }
 0x2d9   :  { %v2341_v14 = vsub.f32 %v2688_v9, %v2338_v10 }
 0x2da   :  { %v2342_v15 = vsub.f32 %v2689_v11, %v2340_v13 }
 0x2db   :  { %2690 = vst [vmem:[%s4108_s3 + $0x10] sm:$0xff] %v2341_v14 }
 0x2dc   :  { %2691 = vst [vmem:[%s4108_s3 + $0x18] sm:$0xff] %v2342_v15 }

</bundles_post_ra>
